<compile_context>
chip_gen: v7x
topology: tpu7x:2x2x1
jax: 0.10.0
libtpu: 0.0.40
codegen_flags: <defaults>
</compile_context>

<pallas_src>
import functools
import math

import jax
import jax.numpy as jnp
from jax.experimental import pallas as pl
from jax.experimental.pallas import tpu as pltpu

# ----- small GPT-2-ish config (stands in for config.model.gpt2) -----
HIDDEN_SIZE = 32        # d_model
HEADS = 4               # nhead
LAYERS = 2              # num_layers
FFN = 4 * HIDDEN_SIZE   # dim_feedforward
SEQ = 8
BATCH = 2
LN_EPS = 1e-5
NEG_INF = -1e9          # additive mask value

WEIGHT_ORDER = ["wqkv", "bqkv", "wo", "bo", "ln1w", "ln1b",
                "w1", "b1", "w2", "b2", "ln2w", "ln2b"]


def _decoder_kernel(pad_ref, x_ref,
                    wqkv_ref, bqkv_ref, wo_ref, bo_ref, ln1w_ref, ln1b_ref,
                    w1_ref, b1_ref, w2_ref, b2_ref, ln2w_ref, ln2b_ref,
                    out_ref, *, num_heads, head_dim):
    S, D = x_ref.shape[1], x_ref.shape[2]
    num_layers = wqkv_ref.shape[0]
    scale = 1.0 / math.sqrt(head_dim)

    # Causal + key-padding additive mask: built ONCE per batch block (hoisted out of
    # the per-layer path).  Only the (1, S) padding row was DMA'd from HBM.
    row = jax.lax.broadcasted_iota(jnp.int32, (S, S), 0)
    col = jax.lax.broadcasted_iota(jnp.int32, (S, S), 1)
    mask = jnp.where(col <= row, 0.0, NEG_INF) + pad_ref[0]          # (S, S)
    # Note: the causal diagonal is never masked, so no softmax row is fully -inf.

    def layer_norm(v, w, b):
        mu = jnp.mean(v, axis=-1, keepdims=True)
        var = jnp.mean((v - mu) ** 2, axis=-1, keepdims=True)
        return (v - mu) * jax.lax.rsqrt(var + LN_EPS) * w + b

    def one_layer(l, x):
        # ----- fused QKV projection: one (S, D) @ (D, 3D) MXU op -----
        qkv = jnp.dot(x, wqkv_ref[l],
                      preferred_element_type=jnp.float32) + bqkv_ref[l]   # (S, 3D)
        q, k, v = qkv[:, :D], qkv[:, D:2 * D], qkv[:, 2 * D:]

        # ----- attention: per-head static lane slices (avoids a sublane<->leading
        # transpose relayout; MXU op count is identical to a head-batched einsum).
        ctx_heads = []
        for h in range(num_heads):
            sl = slice(h * head_dim, (h + 1) * head_dim)
            qh, kh, vh = q[:, sl], k[:, sl], v[:, sl]
            s = jax.lax.dot_general(qh, kh, (((1,), (1,)), ((), ())),
                                    preferred_element_type=jnp.float32)  # (S, S)
            s = s * scale + mask
            m = jnp.max(s, axis=-1, keepdims=True)
            p = jnp.exp(s - m)
            # Normalize with the EUP approximate reciprocal instead of a VPU divide.
            p = p * pl.reciprocal(jnp.sum(p, axis=-1, keepdims=True), approx=True)
            ctx_heads.append(jnp.dot(p, vh, preferred_element_type=jnp.float32))
        ctx = jnp.concatenate(ctx_heads, axis=-1)                         # (S, D)

        # ----- single full-width output projection -----
        attn = jnp.dot(ctx, wo_ref[l],
                       preferred_element_type=jnp.float32) + bo_ref[l]    # (S, D)
        x1 = layer_norm(x + attn, ln1w_ref[l], ln1b_ref[l])

        # ----- feed-forward (exact GELU, matches F.gelu default) -----
        h1 = jnp.dot(x1, w1_ref[l], preferred_element_type=jnp.float32) + b1_ref[l]
        h1 = 0.5 * h1 * (1.0 + jax.lax.erf(h1 * (1.0 / math.sqrt(2.0))))
        ff = jnp.dot(h1, w2_ref[l], preferred_element_type=jnp.float32) + b2_ref[l]

        return layer_norm(x1 + ff, ln2w_ref[l], ln2b_ref[l])

    x = jax.lax.fori_loop(0, num_layers, one_layer, x_ref[0], unroll=True)
    out_ref[0] = x


def _stack_params(params):
    """Stack per-layer torch-layout weights with a leading L axis, fuse Q/K/V, and
    pre-transpose every linear to lane-dense (in, out) layout: no `.T`, no per-head
    lane padding inside the kernel."""
    def fuse_qkv_w(p):      # 3x torch (out, in) -> (in=D, out=3D)
        return jnp.concatenate([p["wq"], p["wk"], p["wv"]], axis=0).T

    def fuse_qkv_b(p):      # 3x (1, D) -> (1, 3D)
        return jnp.concatenate([p["bq"], p["bk"], p["bv"]], axis=-1)

    return dict(
        wqkv=jnp.stack([fuse_qkv_w(p) for p in params]),   # (L, D, 3D)
        bqkv=jnp.stack([fuse_qkv_b(p) for p in params]),   # (L, 1, 3D)
        wo=jnp.stack([p["wo"].T for p in params]),          # (L, D, D)
        bo=jnp.stack([p["bo"] for p in params]),            # (L, 1, D)
        ln1w=jnp.stack([p["ln1w"] for p in params]),
        ln1b=jnp.stack([p["ln1b"] for p in params]),
        w1=jnp.stack([p["w1"].T for p in params]),           # (L, D, F)
        b1=jnp.stack([p["b1"] for p in params]),             # (L, 1, F)
        w2=jnp.stack([p["w2"].T for p in params]),           # (L, F, D)
        b2=jnp.stack([p["b2"] for p in params]),
        ln2w=jnp.stack([p["ln2w"] for p in params]),
        ln2b=jnp.stack([p["ln2b"] for p in params]),
    )


def decoder_only_forward(input_ids, padding_mask, params):
    """Matches DecoderOnly.forward: causal mask + key padding mask, N layers,
    single fused pallas_call over grid (BATCH,) with the layer loop in-kernel."""
    B, S, D = input_ids.shape
    hd = D // HEADS

    stacked = _stack_params(params)
    weights = [stacked[name] for name in WEIGHT_ORDER]

    # Only the (B, 1, S) additive padding row is shipped; causal part is in-kernel.
    pad_add = jnp.where(padding_mask, NEG_INF, 0.0).astype(jnp.float32)[:, None, :]
    x = input_ids.astype(jnp.float32)

    # All stacked weights (~100 KiB f32 total) live whole in VMEM for the entire
    # call: one HBM->VMEM copy, no per-grid-step re-DMA, no double buffering.
    vmem_spec = pl.BlockSpec(memory_space=pltpu.MemorySpace.VMEM)
    in_specs = [pl.BlockSpec((1, 1, S), lambda b: (b, 0, 0)),   # padding row
                pl.BlockSpec((1, S, D), lambda b: (b, 0, 0))]   # input activations
    in_specs += [vmem_spec] * len(weights)

    kernel = functools.partial(_decoder_kernel, num_heads=HEADS, head_dim=hd)

    return pl.pallas_call(
        kernel,
        out_shape=jax.ShapeDtypeStruct((B, S, D), jnp.float32),
        grid_spec=pltpu.PrefetchScalarGridSpec(
            num_scalar_prefetch=0,
            grid=(B,),                                   # batch only; layers in-kernel
            in_specs=in_specs,
            out_specs=pl.BlockSpec((1, S, D), lambda b: (b, 0, 0)),
        ),
        compiler_params=pltpu.CompilerParams(
            dimension_semantics=("parallel",)),          # v7x: 2 TCs split the batch
    )(pad_add, x, *weights)


def init_params(key, d_model, ffn, layers):
    params = []
    for _ in range(layers):
        keys = jax.random.split(key, 7)
        key = keys[0]

        def w(k, shape, scale=0.02):
            return (scale * jax.random.normal(k, shape)).astype(jnp.float32)

        D = d_model
        params.append(dict(
            wq=w(keys[1], (D, D)), wk=w(keys[2], (D, D)), wv=w(keys[3], (D, D)),
            bq=jnp.zeros((1, D), jnp.float32),
            bk=jnp.zeros((1, D), jnp.float32),
            bv=jnp.zeros((1, D), jnp.float32),
            wo=w(keys[4], (D, D)), bo=jnp.zeros((1, D), jnp.float32),
            ln1w=jnp.ones((1, D), jnp.float32), ln1b=jnp.zeros((1, D), jnp.float32),
            w1=w(keys[5], (ffn, D)), b1=jnp.zeros((1, ffn), jnp.float32),
            w2=w(keys[6], (D, ffn)), b2=jnp.zeros((1, D), jnp.float32),
            ln2w=jnp.ones((1, D), jnp.float32), ln2b=jnp.zeros((1, D), jnp.float32),
        ))
    return params


def _reference_forward(x, padding_mask, params):
    """Pure-JAX reference (same math as the PyTorch post-norm encoder layer)."""
    B, S, D = x.shape
    H, hd = HEADS, D // HEADS
    i = jnp.arange(S)[:, None]
    j = jnp.arange(S)[None, :]
    mask = (jnp.where(j <= i, 0.0, NEG_INF)[None]
            + jnp.where(padding_mask, NEG_INF, 0.0)[:, None, :])     # (B, S, S)

    def ln(v, w, b):
        mu = jnp.mean(v, -1, keepdims=True)
        var = jnp.mean((v - mu) ** 2, -1, keepdims=True)
        return (v - mu) * jax.lax.rsqrt(var + LN_EPS) * w + b

    out = x
    for p in params:
        q = out @ p["wq"].T + p["bq"]
        k = out @ p["wk"].T + p["bk"]
        v = out @ p["wv"].T + p["bv"]
        split = lambda t: t.reshape(B, S, H, hd).transpose(0, 2, 1, 3)
        qh, kh, vh = split(q), split(k), split(v)
        s = jnp.einsum('bhqd,bhkd->bhqk', qh, kh) / math.sqrt(hd) + mask[:, None]
        pa = jax.nn.softmax(s, axis=-1)
        ctx = jnp.einsum('bhqk,bhkd->bhqd', pa, vh).transpose(0, 2, 1, 3).reshape(B, S, D)
        attn = ctx @ p["wo"].T + p["bo"]
        out1 = ln(out + attn, p["ln1w"], p["ln1b"])
        h1 = out1 @ p["w1"].T + p["b1"]
        h1 = 0.5 * h1 * (1.0 + jax.lax.erf(h1 / math.sqrt(2.0)))
        ff = h1 @ p["w2"].T + p["b2"]
        out = ln(out1 + ff, p["ln2w"], p["ln2b"])
    return out


if __name__ == "__main__":
    key = jax.random.PRNGKey(0)
    k_x, k_p = jax.random.split(key)

    # "input_ids" is already an embedded float tensor (it is fed straight into the
    # transformer in the reference module): (B, S, D)
    x = jax.random.normal(k_x, (BATCH, SEQ, HIDDEN_SIZE), dtype=jnp.float32)
    # padding_mask: True = padded (ignored) key position; pad tail of batch 1
    padding_mask = jnp.zeros((BATCH, SEQ), dtype=bool).at[1, -2:].set(True)

    params = init_params(k_p, HIDDEN_SIZE, FFN, LAYERS)

    out = decoder_only_forward(x, padding_mask, params)
    out = jax.block_until_ready(out)
    assert out.shape == (BATCH, SEQ, HIDDEN_SIZE)
    assert bool(jnp.all(jnp.isfinite(out)))

    ref = _reference_forward(x, padding_mask, params)
    # 1e-3 (50x tighter than before): slack only covers the approximate EUP
    # reciprocal in the softmax; all other math is exact f32.
    assert bool(jnp.allclose(out, ref, rtol=1e-3, atol=1e-3)), \
        float(jnp.max(jnp.abs(out - ref)))
    print("KERNEL_OK")
</pallas_src>

<mosaic_0001>
module attributes {stable_mosaic.version = 11 : i64} {
  func.func @_decoder_kernel(%arg0: i32, %arg1: memref<1x1x8xf32, #tpu.memory_space<vmem>>, %arg2: memref<1x8x32xf32, #tpu.memory_space<vmem>>, %arg3: memref<2x32x96xf32, #tpu.memory_space<vmem>>, %arg4: memref<2x1x96xf32, #tpu.memory_space<vmem>>, %arg5: memref<2x32x32xf32, #tpu.memory_space<vmem>>, %arg6: memref<2x1x32xf32, #tpu.memory_space<vmem>>, %arg7: memref<2x1x32xf32, #tpu.memory_space<vmem>>, %arg8: memref<2x1x32xf32, #tpu.memory_space<vmem>>, %arg9: memref<2x32x128xf32, #tpu.memory_space<vmem>>, %arg10: memref<2x1x128xf32, #tpu.memory_space<vmem>>, %arg11: memref<2x128x32xf32, #tpu.memory_space<vmem>>, %arg12: memref<2x1x32xf32, #tpu.memory_space<vmem>>, %arg13: memref<2x1x32xf32, #tpu.memory_space<vmem>>, %arg14: memref<2x1x32xf32, #tpu.memory_space<vmem>>, %arg15: memref<1x8x32xf32, #tpu.memory_space<vmem>>) attributes {dimension_semantics = [#tpu.dimension_semantics<parallel>], iteration_bounds = array<i64: 2>, scalar_prefetch = 0 : i64, scratch_operands = 0 : i64, tpu.core_type = #tpu.core_type<tc>, window_params = [{transform_indices = @transform_0, window_bounds = array<i64: 1, 1, 8>}, {transform_indices = @transform_1, window_bounds = array<i64: 1, 8, 32>}, {pipeline_mode = #tpu.pipeline_mode<synchronous>, transform_indices = @transform_2, window_bounds = array<i64: 2, 32, 96>}, {pipeline_mode = #tpu.pipeline_mode<synchronous>, transform_indices = @transform_3, window_bounds = array<i64: 2, 1, 96>}, {pipeline_mode = #tpu.pipeline_mode<synchronous>, transform_indices = @transform_4, window_bounds = array<i64: 2, 32, 32>}, {pipeline_mode = #tpu.pipeline_mode<synchronous>, transform_indices = @transform_5, window_bounds = array<i64: 2, 1, 32>}, {pipeline_mode = #tpu.pipeline_mode<synchronous>, transform_indices = @transform_6, window_bounds = array<i64: 2, 1, 32>}, {pipeline_mode = #tpu.pipeline_mode<synchronous>, transform_indices = @transform_7, window_bounds = array<i64: 2, 1, 32>}, {pipeline_mode = #tpu.pipeline_mode<synchronous>, transform_indices = @transform_8, window_bounds = array<i64: 2, 32, 128>}, {pipeline_mode = #tpu.pipeline_mode<synchronous>, transform_indices = @transform_9, window_bounds = array<i64: 2, 1, 128>}, {pipeline_mode = #tpu.pipeline_mode<synchronous>, transform_indices = @transform_10, window_bounds = array<i64: 2, 128, 32>}, {pipeline_mode = #tpu.pipeline_mode<synchronous>, transform_indices = @transform_11, window_bounds = array<i64: 2, 1, 32>}, {pipeline_mode = #tpu.pipeline_mode<synchronous>, transform_indices = @transform_12, window_bounds = array<i64: 2, 1, 32>}, {pipeline_mode = #tpu.pipeline_mode<synchronous>, transform_indices = @transform_13, window_bounds = array<i64: 2, 1, 32>}, {transform_indices = @transform_14, window_bounds = array<i64: 1, 8, 32>}]} {
    %0 = tpu.iota {dimensions = array<i32: 0>} : vector<8x8xi32>
    %1 = tpu.iota {dimensions = array<i32: 1>} : vector<8x8xi32>
    %2 = arith.cmpi sle, %1, %0 : vector<8x8xi32>
    %cst = arith.constant 0.000000e+00 : f32
    %cst_0 = arith.constant -1.000000e+09 : f32
    %3 = vector.broadcast %cst : f32 to vector<8x8xf32>
    %4 = vector.broadcast %cst_0 : f32 to vector<8x8xf32>
    %5 = arith.select %2, %3, %4 : vector<8x8xi1>, vector<8x8xf32>
    %c0 = arith.constant 0 : index
    %c0_1 = arith.constant 0 : index
    %c0_2 = arith.constant 0 : index
    %6 = vector.load %arg1[%c0, %c0_1, %c0_2] : memref<1x1x8xf32, #tpu.memory_space<vmem>>, vector<1x1x8xf32>
    %7 = vector.shape_cast %6 : vector<1x1x8xf32> to vector<1x8xf32>
    %8 = vector.broadcast %7 : vector<1x8xf32> to vector<8x8xf32>
    %9 = arith.addf %5, %8 : vector<8x8xf32>
    %c0_3 = arith.constant 0 : index
    %c0_4 = arith.constant 0 : index
    %c0_5 = arith.constant 0 : index
    %10 = vector.load %arg2[%c0_3, %c0_4, %c0_5] : memref<1x8x32xf32, #tpu.memory_space<vmem>>, vector<1x8x32xf32>
    %11 = vector.shape_cast %10 : vector<1x8x32xf32> to vector<8x32xf32>
    %c0_i32 = arith.constant 0 : i32
    %12 = arith.index_cast %c0_i32 : i32 to index
    %c0_6 = arith.constant 0 : index
    %c0_7 = arith.constant 0 : index
    %13 = vector.load %arg3[%12, %c0_6, %c0_7] : memref<2x32x96xf32, #tpu.memory_space<vmem>>, vector<1x32x96xf32>
    %14 = vector.shape_cast %13 : vector<1x32x96xf32> to vector<32x96xf32>
    %cst_8 = arith.constant dense<0.000000e+00> : vector<8x96xf32>
    %15 = tpu.matmul %11, %14, %cst_8 {dimension_numbers = #tpu.dot_dimension_numbers<[1], [0], [0], [1], [0, 0, 1, 1], [], []>} : vector<8x32xf32>, vector<32x96xf32>, vector<8x96xf32> -> vector<8x96xf32>
    %16 = arith.index_cast %c0_i32 : i32 to index
    %c0_9 = arith.constant 0 : index
    %c0_10 = arith.constant 0 : index
    %17 = vector.load %arg4[%16, %c0_9, %c0_10] : memref<2x1x96xf32, #tpu.memory_space<vmem>>, vector<1x1x96xf32>
    %18 = vector.shape_cast %17 : vector<1x1x96xf32> to vector<1x96xf32>
    %19 = vector.broadcast %18 : vector<1x96xf32> to vector<8x96xf32>
    %20 = arith.addf %15, %19 : vector<8x96xf32>
    %21 = vector.extract_strided_slice %20 {offsets = [0, 0], sizes = [8, 32], strides = [1, 1]} : vector<8x96xf32> to vector<8x32xf32>
    %22 = vector.extract_strided_slice %20 {offsets = [0, 32], sizes = [8, 32], strides = [1, 1]} : vector<8x96xf32> to vector<8x32xf32>
    %23 = vector.extract_strided_slice %20 {offsets = [0, 64], sizes = [8, 32], strides = [1, 1]} : vector<8x96xf32> to vector<8x32xf32>
    %24 = vector.extract_strided_slice %21 {offsets = [0, 0], sizes = [8, 8], strides = [1, 1]} : vector<8x32xf32> to vector<8x8xf32>
    %25 = vector.extract_strided_slice %22 {offsets = [0, 0], sizes = [8, 8], strides = [1, 1]} : vector<8x32xf32> to vector<8x8xf32>
    %26 = vector.extract_strided_slice %23 {offsets = [0, 0], sizes = [8, 8], strides = [1, 1]} : vector<8x32xf32> to vector<8x8xf32>
    %cst_11 = arith.constant dense<0.000000e+00> : vector<8x8xf32>
    %27 = tpu.matmul %24, %25, %cst_11 {dimension_numbers = #tpu.dot_dimension_numbers<[1], [1], [0], [0], [0, 0, 1, 0], [], []>} : vector<8x8xf32>, vector<8x8xf32>, vector<8x8xf32> -> vector<8x8xf32>
    %cst_12 = arith.constant 0.353553385 : f32
    %28 = vector.broadcast %cst_12 : f32 to vector<8x8xf32>
    %29 = arith.mulf %27, %28 : vector<8x8xf32>
    %30 = arith.addf %29, %9 : vector<8x8xf32>
    %cst_13 = arith.constant dense<0xFF800000> : vector<8xf32>
    %31 = vector.multi_reduction <maximumf>, %30, %cst_13 [1] : vector<8x8xf32> to vector<8xf32>
    %32 = vector.shape_cast %31 : vector<8xf32> to vector<8x1xf32>
    %33 = vector.broadcast %32 : vector<8x1xf32> to vector<8x8xf32>
    %34 = arith.subf %30, %33 : vector<8x8xf32>
    %35 = math.exp %34 : vector<8x8xf32>
    %cst_14 = arith.constant dense<0.000000e+00> : vector<8xf32>
    %36 = vector.multi_reduction <add>, %35, %cst_14 [1] : vector<8x8xf32> to vector<8xf32>
    %37 = vector.shape_cast %36 : vector<8xf32> to vector<8x1xf32>
    %38 = tpu.reciprocal %37 {approx = true} : vector<8x1xf32> -> vector<8x1xf32>
    %39 = vector.broadcast %38 : vector<8x1xf32> to vector<8x8xf32>
    %40 = arith.mulf %35, %39 : vector<8x8xf32>
    %cst_15 = arith.constant dense<0.000000e+00> : vector<8x8xf32>
    %41 = tpu.matmul %40, %26, %cst_15 {dimension_numbers = #tpu.dot_dimension_numbers<[1], [0], [0], [1], [0, 0, 1, 1], [], []>} : vector<8x8xf32>, vector<8x8xf32>, vector<8x8xf32> -> vector<8x8xf32>
    %42 = vector.extract_strided_slice %21 {offsets = [0, 8], sizes = [8, 8], strides = [1, 1]} : vector<8x32xf32> to vector<8x8xf32>
    %43 = vector.extract_strided_slice %22 {offsets = [0, 8], sizes = [8, 8], strides = [1, 1]} : vector<8x32xf32> to vector<8x8xf32>
    %44 = vector.extract_strided_slice %23 {offsets = [0, 8], sizes = [8, 8], strides = [1, 1]} : vector<8x32xf32> to vector<8x8xf32>
    %cst_16 = arith.constant dense<0.000000e+00> : vector<8x8xf32>
    %45 = tpu.matmul %42, %43, %cst_16 {dimension_numbers = #tpu.dot_dimension_numbers<[1], [1], [0], [0], [0, 0, 1, 0], [], []>} : vector<8x8xf32>, vector<8x8xf32>, vector<8x8xf32> -> vector<8x8xf32>
    %cst_17 = arith.constant 0.353553385 : f32
    %46 = vector.broadcast %cst_17 : f32 to vector<8x8xf32>
    %47 = arith.mulf %45, %46 : vector<8x8xf32>
    %48 = arith.addf %47, %9 : vector<8x8xf32>
    %cst_18 = arith.constant dense<0xFF800000> : vector<8xf32>
    %49 = vector.multi_reduction <maximumf>, %48, %cst_18 [1] : vector<8x8xf32> to vector<8xf32>
    %50 = vector.shape_cast %49 : vector<8xf32> to vector<8x1xf32>
    %51 = vector.broadcast %50 : vector<8x1xf32> to vector<8x8xf32>
    %52 = arith.subf %48, %51 : vector<8x8xf32>
    %53 = math.exp %52 : vector<8x8xf32>
    %cst_19 = arith.constant dense<0.000000e+00> : vector<8xf32>
    %54 = vector.multi_reduction <add>, %53, %cst_19 [1] : vector<8x8xf32> to vector<8xf32>
    %55 = vector.shape_cast %54 : vector<8xf32> to vector<8x1xf32>
    %56 = tpu.reciprocal %55 {approx = true} : vector<8x1xf32> -> vector<8x1xf32>
    %57 = vector.broadcast %56 : vector<8x1xf32> to vector<8x8xf32>
    %58 = arith.mulf %53, %57 : vector<8x8xf32>
    %cst_20 = arith.constant dense<0.000000e+00> : vector<8x8xf32>
    %59 = tpu.matmul %58, %44, %cst_20 {dimension_numbers = #tpu.dot_dimension_numbers<[1], [0], [0], [1], [0, 0, 1, 1], [], []>} : vector<8x8xf32>, vector<8x8xf32>, vector<8x8xf32> -> vector<8x8xf32>
    %60 = vector.extract_strided_slice %21 {offsets = [0, 16], sizes = [8, 8], strides = [1, 1]} : vector<8x32xf32> to vector<8x8xf32>
    %61 = vector.extract_strided_slice %22 {offsets = [0, 16], sizes = [8, 8], strides = [1, 1]} : vector<8x32xf32> to vector<8x8xf32>
    %62 = vector.extract_strided_slice %23 {offsets = [0, 16], sizes = [8, 8], strides = [1, 1]} : vector<8x32xf32> to vector<8x8xf32>
    %cst_21 = arith.constant dense<0.000000e+00> : vector<8x8xf32>
    %63 = tpu.matmul %60, %61, %cst_21 {dimension_numbers = #tpu.dot_dimension_numbers<[1], [1], [0], [0], [0, 0, 1, 0], [], []>} : vector<8x8xf32>, vector<8x8xf32>, vector<8x8xf32> -> vector<8x8xf32>
    %cst_22 = arith.constant 0.353553385 : f32
    %64 = vector.broadcast %cst_22 : f32 to vector<8x8xf32>
    %65 = arith.mulf %63, %64 : vector<8x8xf32>
    %66 = arith.addf %65, %9 : vector<8x8xf32>
    %cst_23 = arith.constant dense<0xFF800000> : vector<8xf32>
    %67 = vector.multi_reduction <maximumf>, %66, %cst_23 [1] : vector<8x8xf32> to vector<8xf32>
    %68 = vector.shape_cast %67 : vector<8xf32> to vector<8x1xf32>
    %69 = vector.broadcast %68 : vector<8x1xf32> to vector<8x8xf32>
    %70 = arith.subf %66, %69 : vector<8x8xf32>
    %71 = math.exp %70 : vector<8x8xf32>
    %cst_24 = arith.constant dense<0.000000e+00> : vector<8xf32>
    %72 = vector.multi_reduction <add>, %71, %cst_24 [1] : vector<8x8xf32> to vector<8xf32>
    %73 = vector.shape_cast %72 : vector<8xf32> to vector<8x1xf32>
    %74 = tpu.reciprocal %73 {approx = true} : vector<8x1xf32> -> vector<8x1xf32>
    %75 = vector.broadcast %74 : vector<8x1xf32> to vector<8x8xf32>
    %76 = arith.mulf %71, %75 : vector<8x8xf32>
    %cst_25 = arith.constant dense<0.000000e+00> : vector<8x8xf32>
    %77 = tpu.matmul %76, %62, %cst_25 {dimension_numbers = #tpu.dot_dimension_numbers<[1], [0], [0], [1], [0, 0, 1, 1], [], []>} : vector<8x8xf32>, vector<8x8xf32>, vector<8x8xf32> -> vector<8x8xf32>
    %78 = vector.extract_strided_slice %21 {offsets = [0, 24], sizes = [8, 8], strides = [1, 1]} : vector<8x32xf32> to vector<8x8xf32>
    %79 = vector.extract_strided_slice %22 {offsets = [0, 24], sizes = [8, 8], strides = [1, 1]} : vector<8x32xf32> to vector<8x8xf32>
    %80 = vector.extract_strided_slice %23 {offsets = [0, 24], sizes = [8, 8], strides = [1, 1]} : vector<8x32xf32> to vector<8x8xf32>
    %cst_26 = arith.constant dense<0.000000e+00> : vector<8x8xf32>
    %81 = tpu.matmul %78, %79, %cst_26 {dimension_numbers = #tpu.dot_dimension_numbers<[1], [1], [0], [0], [0, 0, 1, 0], [], []>} : vector<8x8xf32>, vector<8x8xf32>, vector<8x8xf32> -> vector<8x8xf32>
    %cst_27 = arith.constant 0.353553385 : f32
    %82 = vector.broadcast %cst_27 : f32 to vector<8x8xf32>
    %83 = arith.mulf %81, %82 : vector<8x8xf32>
    %84 = arith.addf %83, %9 : vector<8x8xf32>
    %cst_28 = arith.constant dense<0xFF800000> : vector<8xf32>
    %85 = vector.multi_reduction <maximumf>, %84, %cst_28 [1] : vector<8x8xf32> to vector<8xf32>
    %86 = vector.shape_cast %85 : vector<8xf32> to vector<8x1xf32>
    %87 = vector.broadcast %86 : vector<8x1xf32> to vector<8x8xf32>
    %88 = arith.subf %84, %87 : vector<8x8xf32>
    %89 = math.exp %88 : vector<8x8xf32>
    %cst_29 = arith.constant dense<0.000000e+00> : vector<8xf32>
    %90 = vector.multi_reduction <add>, %89, %cst_29 [1] : vector<8x8xf32> to vector<8xf32>
    %91 = vector.shape_cast %90 : vector<8xf32> to vector<8x1xf32>
    %92 = tpu.reciprocal %91 {approx = true} : vector<8x1xf32> -> vector<8x1xf32>
    %93 = vector.broadcast %92 : vector<8x1xf32> to vector<8x8xf32>
    %94 = arith.mulf %89, %93 : vector<8x8xf32>
    %cst_30 = arith.constant dense<0.000000e+00> : vector<8x8xf32>
    %95 = tpu.matmul %94, %80, %cst_30 {dimension_numbers = #tpu.dot_dimension_numbers<[1], [0], [0], [1], [0, 0, 1, 1], [], []>} : vector<8x8xf32>, vector<8x8xf32>, vector<8x8xf32> -> vector<8x8xf32>
    %96 = tpu.concatenate %41, %59, %77, %95 in 1 : vector<8x8xf32>, vector<8x8xf32>, vector<8x8xf32>, vector<8x8xf32> -> vector<8x32xf32>
    %97 = arith.index_cast %c0_i32 : i32 to index
    %c0_31 = arith.constant 0 : index
    %c0_32 = arith.constant 0 : index
    %98 = vector.load %arg5[%97, %c0_31, %c0_32] : memref<2x32x32xf32, #tpu.memory_space<vmem>>, vector<1x32x32xf32>
    %99 = vector.shape_cast %98 : vector<1x32x32xf32> to vector<32x32xf32>
    %cst_33 = arith.constant dense<0.000000e+00> : vector<8x32xf32>
    %100 = tpu.matmul %96, %99, %cst_33 {dimension_numbers = #tpu.dot_dimension_numbers<[1], [0], [0], [1], [0, 0, 1, 1], [], []>} : vector<8x32xf32>, vector<32x32xf32>, vector<8x32xf32> -> vector<8x32xf32>
    %101 = arith.index_cast %c0_i32 : i32 to index
    %c0_34 = arith.constant 0 : index
    %c0_35 = arith.constant 0 : index
    %102 = vector.load %arg6[%101, %c0_34, %c0_35] : memref<2x1x32xf32, #tpu.memory_space<vmem>>, vector<1x1x32xf32>
    %103 = vector.shape_cast %102 : vector<1x1x32xf32> to vector<1x32xf32>
    %104 = vector.broadcast %103 : vector<1x32xf32> to vector<8x32xf32>
    %105 = arith.addf %100, %104 : vector<8x32xf32>
    %106 = arith.addf %11, %105 : vector<8x32xf32>
    %107 = arith.index_cast %c0_i32 : i32 to index
    %c0_36 = arith.constant 0 : index
    %c0_37 = arith.constant 0 : index
    %108 = vector.load %arg7[%107, %c0_36, %c0_37] : memref<2x1x32xf32, #tpu.memory_space<vmem>>, vector<1x1x32xf32>
    %109 = vector.shape_cast %108 : vector<1x1x32xf32> to vector<1x32xf32>
    %110 = arith.index_cast %c0_i32 : i32 to index
    %c0_38 = arith.constant 0 : index
    %c0_39 = arith.constant 0 : index
    %111 = vector.load %arg8[%110, %c0_38, %c0_39] : memref<2x1x32xf32, #tpu.memory_space<vmem>>, vector<1x1x32xf32>
    %112 = vector.shape_cast %111 : vector<1x1x32xf32> to vector<1x32xf32>
    %cst_40 = arith.constant dense<0.000000e+00> : vector<8xf32>
    %113 = vector.multi_reduction <add>, %106, %cst_40 [1] : vector<8x32xf32> to vector<8xf32>
    %114 = vector.shape_cast %113 : vector<8xf32> to vector<8x1xf32>
    %cst_41 = arith.constant 3.200000e+01 : f32
    %115 = vector.broadcast %cst_41 : f32 to vector<8x1xf32>
    %116 = arith.divf %114, %115 : vector<8x1xf32>
    %117 = vector.broadcast %116 : vector<8x1xf32> to vector<8x32xf32>
    %118 = arith.subf %106, %117 : vector<8x32xf32>
    %119 = arith.mulf %118, %118 : vector<8x32xf32>
    %cst_42 = arith.constant dense<0.000000e+00> : vector<8xf32>
    %120 = vector.multi_reduction <add>, %119, %cst_42 [1] : vector<8x32xf32> to vector<8xf32>
    %121 = vector.shape_cast %120 : vector<8xf32> to vector<8x1xf32>
    %cst_43 = arith.constant 3.200000e+01 : f32
    %122 = vector.broadcast %cst_43 : f32 to vector<8x1xf32>
    %123 = arith.divf %121, %122 : vector<8x1xf32>
    %124 = vector.broadcast %116 : vector<8x1xf32> to vector<8x32xf32>
    %125 = arith.subf %106, %124 : vector<8x32xf32>
    %cst_44 = arith.constant 9.99999974E-6 : f32
    %126 = vector.broadcast %cst_44 : f32 to vector<8x1xf32>
    %127 = arith.addf %123, %126 : vector<8x1xf32>
    %128 = math.rsqrt %127 : vector<8x1xf32>
    %129 = vector.broadcast %128 : vector<8x1xf32> to vector<8x32xf32>
    %130 = arith.mulf %125, %129 : vector<8x32xf32>
    %131 = vector.broadcast %109 : vector<1x32xf32> to vector<8x32xf32>
    %132 = arith.mulf %130, %131 : vector<8x32xf32>
    %133 = vector.broadcast %112 : vector<1x32xf32> to vector<8x32xf32>
    %134 = arith.addf %132, %133 : vector<8x32xf32>
    %135 = arith.index_cast %c0_i32 : i32 to index
    %c0_45 = arith.constant 0 : index
    %c0_46 = arith.constant 0 : index
    %136 = vector.load %arg9[%135, %c0_45, %c0_46] : memref<2x32x128xf32, #tpu.memory_space<vmem>>, vector<1x32x128xf32>
    %137 = vector.shape_cast %136 : vector<1x32x128xf32> to vector<32x128xf32>
    %cst_47 = arith.constant dense<0.000000e+00> : vector<8x128xf32>
    %138 = tpu.matmul %134, %137, %cst_47 {dimension_numbers = #tpu.dot_dimension_numbers<[1], [0], [0], [1], [0, 0, 1, 1], [], []>} : vector<8x32xf32>, vector<32x128xf32>, vector<8x128xf32> -> vector<8x128xf32>
    %139 = arith.index_cast %c0_i32 : i32 to index
    %c0_48 = arith.constant 0 : index
    %c0_49 = arith.constant 0 : index
    %140 = vector.load %arg10[%139, %c0_48, %c0_49] : memref<2x1x128xf32, #tpu.memory_space<vmem>>, vector<1x1x128xf32>
    %141 = vector.shape_cast %140 : vector<1x1x128xf32> to vector<1x128xf32>
    %142 = vector.broadcast %141 : vector<1x128xf32> to vector<8x128xf32>
    %143 = arith.addf %138, %142 : vector<8x128xf32>
    %cst_50 = arith.constant 5.000000e-01 : f32
    %144 = vector.broadcast %cst_50 : f32 to vector<8x128xf32>
    %145 = arith.mulf %144, %143 : vector<8x128xf32>
    %cst_51 = arith.constant 0.707106769 : f32
    %146 = vector.broadcast %cst_51 : f32 to vector<8x128xf32>
    %147 = arith.mulf %143, %146 : vector<8x128xf32>
    %148 = math.erf %147 : vector<8x128xf32>
    %cst_52 = arith.constant 1.000000e+00 : f32
    %149 = vector.broadcast %cst_52 : f32 to vector<8x128xf32>
    %150 = arith.addf %149, %148 : vector<8x128xf32>
    %151 = arith.mulf %145, %150 : vector<8x128xf32>
    %152 = arith.index_cast %c0_i32 : i32 to index
    %c0_53 = arith.constant 0 : index
    %c0_54 = arith.constant 0 : index
    %153 = vector.load %arg11[%152, %c0_53, %c0_54] : memref<2x128x32xf32, #tpu.memory_space<vmem>>, vector<1x128x32xf32>
    %154 = vector.shape_cast %153 : vector<1x128x32xf32> to vector<128x32xf32>
    %cst_55 = arith.constant dense<0.000000e+00> : vector<8x32xf32>
    %155 = tpu.matmul %151, %154, %cst_55 {dimension_numbers = #tpu.dot_dimension_numbers<[1], [0], [0], [1], [0, 0, 1, 1], [], []>} : vector<8x128xf32>, vector<128x32xf32>, vector<8x32xf32> -> vector<8x32xf32>
    %156 = arith.index_cast %c0_i32 : i32 to index
    %c0_56 = arith.constant 0 : index
    %c0_57 = arith.constant 0 : index
    %157 = vector.load %arg12[%156, %c0_56, %c0_57] : memref<2x1x32xf32, #tpu.memory_space<vmem>>, vector<1x1x32xf32>
    %158 = vector.shape_cast %157 : vector<1x1x32xf32> to vector<1x32xf32>
    %159 = vector.broadcast %158 : vector<1x32xf32> to vector<8x32xf32>
    %160 = arith.addf %155, %159 : vector<8x32xf32>
    %161 = arith.addf %134, %160 : vector<8x32xf32>
    %162 = arith.index_cast %c0_i32 : i32 to index
    %c0_58 = arith.constant 0 : index
    %c0_59 = arith.constant 0 : index
    %163 = vector.load %arg13[%162, %c0_58, %c0_59] : memref<2x1x32xf32, #tpu.memory_space<vmem>>, vector<1x1x32xf32>
    %164 = vector.shape_cast %163 : vector<1x1x32xf32> to vector<1x32xf32>
    %165 = arith.index_cast %c0_i32 : i32 to index
    %c0_60 = arith.constant 0 : index
    %c0_61 = arith.constant 0 : index
    %166 = vector.load %arg14[%165, %c0_60, %c0_61] : memref<2x1x32xf32, #tpu.memory_space<vmem>>, vector<1x1x32xf32>
    %167 = vector.shape_cast %166 : vector<1x1x32xf32> to vector<1x32xf32>
    %cst_62 = arith.constant dense<0.000000e+00> : vector<8xf32>
    %168 = vector.multi_reduction <add>, %161, %cst_62 [1] : vector<8x32xf32> to vector<8xf32>
    %169 = vector.shape_cast %168 : vector<8xf32> to vector<8x1xf32>
    %cst_63 = arith.constant 3.200000e+01 : f32
    %170 = vector.broadcast %cst_63 : f32 to vector<8x1xf32>
    %171 = arith.divf %169, %170 : vector<8x1xf32>
    %172 = vector.broadcast %171 : vector<8x1xf32> to vector<8x32xf32>
    %173 = arith.subf %161, %172 : vector<8x32xf32>
    %174 = arith.mulf %173, %173 : vector<8x32xf32>
    %cst_64 = arith.constant dense<0.000000e+00> : vector<8xf32>
    %175 = vector.multi_reduction <add>, %174, %cst_64 [1] : vector<8x32xf32> to vector<8xf32>
    %176 = vector.shape_cast %175 : vector<8xf32> to vector<8x1xf32>
    %cst_65 = arith.constant 3.200000e+01 : f32
    %177 = vector.broadcast %cst_65 : f32 to vector<8x1xf32>
    %178 = arith.divf %176, %177 : vector<8x1xf32>
    %179 = vector.broadcast %171 : vector<8x1xf32> to vector<8x32xf32>
    %180 = arith.subf %161, %179 : vector<8x32xf32>
    %cst_66 = arith.constant 9.99999974E-6 : f32
    %181 = vector.broadcast %cst_66 : f32 to vector<8x1xf32>
    %182 = arith.addf %178, %181 : vector<8x1xf32>
    %183 = math.rsqrt %182 : vector<8x1xf32>
    %184 = vector.broadcast %183 : vector<8x1xf32> to vector<8x32xf32>
    %185 = arith.mulf %180, %184 : vector<8x32xf32>
    %186 = vector.broadcast %164 : vector<1x32xf32> to vector<8x32xf32>
    %187 = arith.mulf %185, %186 : vector<8x32xf32>
    %188 = vector.broadcast %167 : vector<1x32xf32> to vector<8x32xf32>
    %189 = arith.addf %187, %188 : vector<8x32xf32>
    %c1_i32 = arith.constant 1 : i32
    %190 = arith.index_cast %c1_i32 : i32 to index
    %c0_67 = arith.constant 0 : index
    %c0_68 = arith.constant 0 : index
    %191 = vector.load %arg3[%190, %c0_67, %c0_68] : memref<2x32x96xf32, #tpu.memory_space<vmem>>, vector<1x32x96xf32>
    %192 = vector.shape_cast %191 : vector<1x32x96xf32> to vector<32x96xf32>
    %cst_69 = arith.constant dense<0.000000e+00> : vector<8x96xf32>
    %193 = tpu.matmul %189, %192, %cst_69 {dimension_numbers = #tpu.dot_dimension_numbers<[1], [0], [0], [1], [0, 0, 1, 1], [], []>} : vector<8x32xf32>, vector<32x96xf32>, vector<8x96xf32> -> vector<8x96xf32>
    %194 = arith.index_cast %c1_i32 : i32 to index
    %c0_70 = arith.constant 0 : index
    %c0_71 = arith.constant 0 : index
    %195 = vector.load %arg4[%194, %c0_70, %c0_71] : memref<2x1x96xf32, #tpu.memory_space<vmem>>, vector<1x1x96xf32>
    %196 = vector.shape_cast %195 : vector<1x1x96xf32> to vector<1x96xf32>
    %197 = vector.broadcast %196 : vector<1x96xf32> to vector<8x96xf32>
    %198 = arith.addf %193, %197 : vector<8x96xf32>
    %199 = vector.extract_strided_slice %198 {offsets = [0, 0], sizes = [8, 32], strides = [1, 1]} : vector<8x96xf32> to vector<8x32xf32>
    %200 = vector.extract_strided_slice %198 {offsets = [0, 32], sizes = [8, 32], strides = [1, 1]} : vector<8x96xf32> to vector<8x32xf32>
    %201 = vector.extract_strided_slice %198 {offsets = [0, 64], sizes = [8, 32], strides = [1, 1]} : vector<8x96xf32> to vector<8x32xf32>
    %202 = vector.extract_strided_slice %199 {offsets = [0, 0], sizes = [8, 8], strides = [1, 1]} : vector<8x32xf32> to vector<8x8xf32>
    %203 = vector.extract_strided_slice %200 {offsets = [0, 0], sizes = [8, 8], strides = [1, 1]} : vector<8x32xf32> to vector<8x8xf32>
    %204 = vector.extract_strided_slice %201 {offsets = [0, 0], sizes = [8, 8], strides = [1, 1]} : vector<8x32xf32> to vector<8x8xf32>
    %cst_72 = arith.constant dense<0.000000e+00> : vector<8x8xf32>
    %205 = tpu.matmul %202, %203, %cst_72 {dimension_numbers = #tpu.dot_dimension_numbers<[1], [1], [0], [0], [0, 0, 1, 0], [], []>} : vector<8x8xf32>, vector<8x8xf32>, vector<8x8xf32> -> vector<8x8xf32>
    %cst_73 = arith.constant 0.353553385 : f32
    %206 = vector.broadcast %cst_73 : f32 to vector<8x8xf32>
    %207 = arith.mulf %205, %206 : vector<8x8xf32>
    %208 = arith.addf %207, %9 : vector<8x8xf32>
    %cst_74 = arith.constant dense<0xFF800000> : vector<8xf32>
    %209 = vector.multi_reduction <maximumf>, %208, %cst_74 [1] : vector<8x8xf32> to vector<8xf32>
    %210 = vector.shape_cast %209 : vector<8xf32> to vector<8x1xf32>
    %211 = vector.broadcast %210 : vector<8x1xf32> to vector<8x8xf32>
    %212 = arith.subf %208, %211 : vector<8x8xf32>
    %213 = math.exp %212 : vector<8x8xf32>
    %cst_75 = arith.constant dense<0.000000e+00> : vector<8xf32>
    %214 = vector.multi_reduction <add>, %213, %cst_75 [1] : vector<8x8xf32> to vector<8xf32>
    %215 = vector.shape_cast %214 : vector<8xf32> to vector<8x1xf32>
    %216 = tpu.reciprocal %215 {approx = true} : vector<8x1xf32> -> vector<8x1xf32>
    %217 = vector.broadcast %216 : vector<8x1xf32> to vector<8x8xf32>
    %218 = arith.mulf %213, %217 : vector<8x8xf32>
    %cst_76 = arith.constant dense<0.000000e+00> : vector<8x8xf32>
    %219 = tpu.matmul %218, %204, %cst_76 {dimension_numbers = #tpu.dot_dimension_numbers<[1], [0], [0], [1], [0, 0, 1, 1], [], []>} : vector<8x8xf32>, vector<8x8xf32>, vector<8x8xf32> -> vector<8x8xf32>
    %220 = vector.extract_strided_slice %199 {offsets = [0, 8], sizes = [8, 8], strides = [1, 1]} : vector<8x32xf32> to vector<8x8xf32>
    %221 = vector.extract_strided_slice %200 {offsets = [0, 8], sizes = [8, 8], strides = [1, 1]} : vector<8x32xf32> to vector<8x8xf32>
    %222 = vector.extract_strided_slice %201 {offsets = [0, 8], sizes = [8, 8], strides = [1, 1]} : vector<8x32xf32> to vector<8x8xf32>
    %cst_77 = arith.constant dense<0.000000e+00> : vector<8x8xf32>
    %223 = tpu.matmul %220, %221, %cst_77 {dimension_numbers = #tpu.dot_dimension_numbers<[1], [1], [0], [0], [0, 0, 1, 0], [], []>} : vector<8x8xf32>, vector<8x8xf32>, vector<8x8xf32> -> vector<8x8xf32>
    %cst_78 = arith.constant 0.353553385 : f32
    %224 = vector.broadcast %cst_78 : f32 to vector<8x8xf32>
    %225 = arith.mulf %223, %224 : vector<8x8xf32>
    %226 = arith.addf %225, %9 : vector<8x8xf32>
    %cst_79 = arith.constant dense<0xFF800000> : vector<8xf32>
    %227 = vector.multi_reduction <maximumf>, %226, %cst_79 [1] : vector<8x8xf32> to vector<8xf32>
    %228 = vector.shape_cast %227 : vector<8xf32> to vector<8x1xf32>
    %229 = vector.broadcast %228 : vector<8x1xf32> to vector<8x8xf32>
    %230 = arith.subf %226, %229 : vector<8x8xf32>
    %231 = math.exp %230 : vector<8x8xf32>
    %cst_80 = arith.constant dense<0.000000e+00> : vector<8xf32>
    %232 = vector.multi_reduction <add>, %231, %cst_80 [1] : vector<8x8xf32> to vector<8xf32>
    %233 = vector.shape_cast %232 : vector<8xf32> to vector<8x1xf32>
    %234 = tpu.reciprocal %233 {approx = true} : vector<8x1xf32> -> vector<8x1xf32>
    %235 = vector.broadcast %234 : vector<8x1xf32> to vector<8x8xf32>
    %236 = arith.mulf %231, %235 : vector<8x8xf32>
    %cst_81 = arith.constant dense<0.000000e+00> : vector<8x8xf32>
    %237 = tpu.matmul %236, %222, %cst_81 {dimension_numbers = #tpu.dot_dimension_numbers<[1], [0], [0], [1], [0, 0, 1, 1], [], []>} : vector<8x8xf32>, vector<8x8xf32>, vector<8x8xf32> -> vector<8x8xf32>
    %238 = vector.extract_strided_slice %199 {offsets = [0, 16], sizes = [8, 8], strides = [1, 1]} : vector<8x32xf32> to vector<8x8xf32>
    %239 = vector.extract_strided_slice %200 {offsets = [0, 16], sizes = [8, 8], strides = [1, 1]} : vector<8x32xf32> to vector<8x8xf32>
    %240 = vector.extract_strided_slice %201 {offsets = [0, 16], sizes = [8, 8], strides = [1, 1]} : vector<8x32xf32> to vector<8x8xf32>
    %cst_82 = arith.constant dense<0.000000e+00> : vector<8x8xf32>
    %241 = tpu.matmul %238, %239, %cst_82 {dimension_numbers = #tpu.dot_dimension_numbers<[1], [1], [0], [0], [0, 0, 1, 0], [], []>} : vector<8x8xf32>, vector<8x8xf32>, vector<8x8xf32> -> vector<8x8xf32>
    %cst_83 = arith.constant 0.353553385 : f32
    %242 = vector.broadcast %cst_83 : f32 to vector<8x8xf32>
    %243 = arith.mulf %241, %242 : vector<8x8xf32>
    %244 = arith.addf %243, %9 : vector<8x8xf32>
    %cst_84 = arith.constant dense<0xFF800000> : vector<8xf32>
    %245 = vector.multi_reduction <maximumf>, %244, %cst_84 [1] : vector<8x8xf32> to vector<8xf32>
    %246 = vector.shape_cast %245 : vector<8xf32> to vector<8x1xf32>
    %247 = vector.broadcast %246 : vector<8x1xf32> to vector<8x8xf32>
    %248 = arith.subf %244, %247 : vector<8x8xf32>
    %249 = math.exp %248 : vector<8x8xf32>
    %cst_85 = arith.constant dense<0.000000e+00> : vector<8xf32>
    %250 = vector.multi_reduction <add>, %249, %cst_85 [1] : vector<8x8xf32> to vector<8xf32>
    %251 = vector.shape_cast %250 : vector<8xf32> to vector<8x1xf32>
    %252 = tpu.reciprocal %251 {approx = true} : vector<8x1xf32> -> vector<8x1xf32>
    %253 = vector.broadcast %252 : vector<8x1xf32> to vector<8x8xf32>
    %254 = arith.mulf %249, %253 : vector<8x8xf32>
    %cst_86 = arith.constant dense<0.000000e+00> : vector<8x8xf32>
    %255 = tpu.matmul %254, %240, %cst_86 {dimension_numbers = #tpu.dot_dimension_numbers<[1], [0], [0], [1], [0, 0, 1, 1], [], []>} : vector<8x8xf32>, vector<8x8xf32>, vector<8x8xf32> -> vector<8x8xf32>
    %256 = vector.extract_strided_slice %199 {offsets = [0, 24], sizes = [8, 8], strides = [1, 1]} : vector<8x32xf32> to vector<8x8xf32>
    %257 = vector.extract_strided_slice %200 {offsets = [0, 24], sizes = [8, 8], strides = [1, 1]} : vector<8x32xf32> to vector<8x8xf32>
    %258 = vector.extract_strided_slice %201 {offsets = [0, 24], sizes = [8, 8], strides = [1, 1]} : vector<8x32xf32> to vector<8x8xf32>
    %cst_87 = arith.constant dense<0.000000e+00> : vector<8x8xf32>
    %259 = tpu.matmul %256, %257, %cst_87 {dimension_numbers = #tpu.dot_dimension_numbers<[1], [1], [0], [0], [0, 0, 1, 0], [], []>} : vector<8x8xf32>, vector<8x8xf32>, vector<8x8xf32> -> vector<8x8xf32>
    %cst_88 = arith.constant 0.353553385 : f32
    %260 = vector.broadcast %cst_88 : f32 to vector<8x8xf32>
    %261 = arith.mulf %259, %260 : vector<8x8xf32>
    %262 = arith.addf %261, %9 : vector<8x8xf32>
    %cst_89 = arith.constant dense<0xFF800000> : vector<8xf32>
    %263 = vector.multi_reduction <maximumf>, %262, %cst_89 [1] : vector<8x8xf32> to vector<8xf32>
    %264 = vector.shape_cast %263 : vector<8xf32> to vector<8x1xf32>
    %265 = vector.broadcast %264 : vector<8x1xf32> to vector<8x8xf32>
    %266 = arith.subf %262, %265 : vector<8x8xf32>
    %267 = math.exp %266 : vector<8x8xf32>
    %cst_90 = arith.constant dense<0.000000e+00> : vector<8xf32>
    %268 = vector.multi_reduction <add>, %267, %cst_90 [1] : vector<8x8xf32> to vector<8xf32>
    %269 = vector.shape_cast %268 : vector<8xf32> to vector<8x1xf32>
    %270 = tpu.reciprocal %269 {approx = true} : vector<8x1xf32> -> vector<8x1xf32>
    %271 = vector.broadcast %270 : vector<8x1xf32> to vector<8x8xf32>
    %272 = arith.mulf %267, %271 : vector<8x8xf32>
    %cst_91 = arith.constant dense<0.000000e+00> : vector<8x8xf32>
    %273 = tpu.matmul %272, %258, %cst_91 {dimension_numbers = #tpu.dot_dimension_numbers<[1], [0], [0], [1], [0, 0, 1, 1], [], []>} : vector<8x8xf32>, vector<8x8xf32>, vector<8x8xf32> -> vector<8x8xf32>
    %274 = tpu.concatenate %219, %237, %255, %273 in 1 : vector<8x8xf32>, vector<8x8xf32>, vector<8x8xf32>, vector<8x8xf32> -> vector<8x32xf32>
    %275 = arith.index_cast %c1_i32 : i32 to index
    %c0_92 = arith.constant 0 : index
    %c0_93 = arith.constant 0 : index
    %276 = vector.load %arg5[%275, %c0_92, %c0_93] : memref<2x32x32xf32, #tpu.memory_space<vmem>>, vector<1x32x32xf32>
    %277 = vector.shape_cast %276 : vector<1x32x32xf32> to vector<32x32xf32>
    %cst_94 = arith.constant dense<0.000000e+00> : vector<8x32xf32>
    %278 = tpu.matmul %274, %277, %cst_94 {dimension_numbers = #tpu.dot_dimension_numbers<[1], [0], [0], [1], [0, 0, 1, 1], [], []>} : vector<8x32xf32>, vector<32x32xf32>, vector<8x32xf32> -> vector<8x32xf32>
    %279 = arith.index_cast %c1_i32 : i32 to index
    %c0_95 = arith.constant 0 : index
    %c0_96 = arith.constant 0 : index
    %280 = vector.load %arg6[%279, %c0_95, %c0_96] : memref<2x1x32xf32, #tpu.memory_space<vmem>>, vector<1x1x32xf32>
    %281 = vector.shape_cast %280 : vector<1x1x32xf32> to vector<1x32xf32>
    %282 = vector.broadcast %281 : vector<1x32xf32> to vector<8x32xf32>
    %283 = arith.addf %278, %282 : vector<8x32xf32>
    %284 = arith.addf %189, %283 : vector<8x32xf32>
    %285 = arith.index_cast %c1_i32 : i32 to index
    %c0_97 = arith.constant 0 : index
    %c0_98 = arith.constant 0 : index
    %286 = vector.load %arg7[%285, %c0_97, %c0_98] : memref<2x1x32xf32, #tpu.memory_space<vmem>>, vector<1x1x32xf32>
    %287 = vector.shape_cast %286 : vector<1x1x32xf32> to vector<1x32xf32>
    %288 = arith.index_cast %c1_i32 : i32 to index
    %c0_99 = arith.constant 0 : index
    %c0_100 = arith.constant 0 : index
    %289 = vector.load %arg8[%288, %c0_99, %c0_100] : memref<2x1x32xf32, #tpu.memory_space<vmem>>, vector<1x1x32xf32>
    %290 = vector.shape_cast %289 : vector<1x1x32xf32> to vector<1x32xf32>
    %cst_101 = arith.constant dense<0.000000e+00> : vector<8xf32>
    %291 = vector.multi_reduction <add>, %284, %cst_101 [1] : vector<8x32xf32> to vector<8xf32>
    %292 = vector.shape_cast %291 : vector<8xf32> to vector<8x1xf32>
    %cst_102 = arith.constant 3.200000e+01 : f32
    %293 = vector.broadcast %cst_102 : f32 to vector<8x1xf32>
    %294 = arith.divf %292, %293 : vector<8x1xf32>
    %295 = vector.broadcast %294 : vector<8x1xf32> to vector<8x32xf32>
    %296 = arith.subf %284, %295 : vector<8x32xf32>
    %297 = arith.mulf %296, %296 : vector<8x32xf32>
    %cst_103 = arith.constant dense<0.000000e+00> : vector<8xf32>
    %298 = vector.multi_reduction <add>, %297, %cst_103 [1] : vector<8x32xf32> to vector<8xf32>
    %299 = vector.shape_cast %298 : vector<8xf32> to vector<8x1xf32>
    %cst_104 = arith.constant 3.200000e+01 : f32
    %300 = vector.broadcast %cst_104 : f32 to vector<8x1xf32>
    %301 = arith.divf %299, %300 : vector<8x1xf32>
    %302 = vector.broadcast %294 : vector<8x1xf32> to vector<8x32xf32>
    %303 = arith.subf %284, %302 : vector<8x32xf32>
    %cst_105 = arith.constant 9.99999974E-6 : f32
    %304 = vector.broadcast %cst_105 : f32 to vector<8x1xf32>
    %305 = arith.addf %301, %304 : vector<8x1xf32>
    %306 = math.rsqrt %305 : vector<8x1xf32>
    %307 = vector.broadcast %306 : vector<8x1xf32> to vector<8x32xf32>
    %308 = arith.mulf %303, %307 : vector<8x32xf32>
    %309 = vector.broadcast %287 : vector<1x32xf32> to vector<8x32xf32>
    %310 = arith.mulf %308, %309 : vector<8x32xf32>
    %311 = vector.broadcast %290 : vector<1x32xf32> to vector<8x32xf32>
    %312 = arith.addf %310, %311 : vector<8x32xf32>
    %313 = arith.index_cast %c1_i32 : i32 to index
    %c0_106 = arith.constant 0 : index
    %c0_107 = arith.constant 0 : index
    %314 = vector.load %arg9[%313, %c0_106, %c0_107] : memref<2x32x128xf32, #tpu.memory_space<vmem>>, vector<1x32x128xf32>
    %315 = vector.shape_cast %314 : vector<1x32x128xf32> to vector<32x128xf32>
    %cst_108 = arith.constant dense<0.000000e+00> : vector<8x128xf32>
    %316 = tpu.matmul %312, %315, %cst_108 {dimension_numbers = #tpu.dot_dimension_numbers<[1], [0], [0], [1], [0, 0, 1, 1], [], []>} : vector<8x32xf32>, vector<32x128xf32>, vector<8x128xf32> -> vector<8x128xf32>
    %317 = arith.index_cast %c1_i32 : i32 to index
    %c0_109 = arith.constant 0 : index
    %c0_110 = arith.constant 0 : index
    %318 = vector.load %arg10[%317, %c0_109, %c0_110] : memref<2x1x128xf32, #tpu.memory_space<vmem>>, vector<1x1x128xf32>
    %319 = vector.shape_cast %318 : vector<1x1x128xf32> to vector<1x128xf32>
    %320 = vector.broadcast %319 : vector<1x128xf32> to vector<8x128xf32>
    %321 = arith.addf %316, %320 : vector<8x128xf32>
    %cst_111 = arith.constant 5.000000e-01 : f32
    %322 = vector.broadcast %cst_111 : f32 to vector<8x128xf32>
    %323 = arith.mulf %322, %321 : vector<8x128xf32>
    %cst_112 = arith.constant 0.707106769 : f32
    %324 = vector.broadcast %cst_112 : f32 to vector<8x128xf32>
    %325 = arith.mulf %321, %324 : vector<8x128xf32>
    %326 = math.erf %325 : vector<8x128xf32>
    %cst_113 = arith.constant 1.000000e+00 : f32
    %327 = vector.broadcast %cst_113 : f32 to vector<8x128xf32>
    %328 = arith.addf %327, %326 : vector<8x128xf32>
    %329 = arith.mulf %323, %328 : vector<8x128xf32>
    %330 = arith.index_cast %c1_i32 : i32 to index
    %c0_114 = arith.constant 0 : index
    %c0_115 = arith.constant 0 : index
    %331 = vector.load %arg11[%330, %c0_114, %c0_115] : memref<2x128x32xf32, #tpu.memory_space<vmem>>, vector<1x128x32xf32>
    %332 = vector.shape_cast %331 : vector<1x128x32xf32> to vector<128x32xf32>
    %cst_116 = arith.constant dense<0.000000e+00> : vector<8x32xf32>
    %333 = tpu.matmul %329, %332, %cst_116 {dimension_numbers = #tpu.dot_dimension_numbers<[1], [0], [0], [1], [0, 0, 1, 1], [], []>} : vector<8x128xf32>, vector<128x32xf32>, vector<8x32xf32> -> vector<8x32xf32>
    %334 = arith.index_cast %c1_i32 : i32 to index
    %c0_117 = arith.constant 0 : index
    %c0_118 = arith.constant 0 : index
    %335 = vector.load %arg12[%334, %c0_117, %c0_118] : memref<2x1x32xf32, #tpu.memory_space<vmem>>, vector<1x1x32xf32>
    %336 = vector.shape_cast %335 : vector<1x1x32xf32> to vector<1x32xf32>
    %337 = vector.broadcast %336 : vector<1x32xf32> to vector<8x32xf32>
    %338 = arith.addf %333, %337 : vector<8x32xf32>
    %339 = arith.addf %312, %338 : vector<8x32xf32>
    %340 = arith.index_cast %c1_i32 : i32 to index
    %c0_119 = arith.constant 0 : index
    %c0_120 = arith.constant 0 : index
    %341 = vector.load %arg13[%340, %c0_119, %c0_120] : memref<2x1x32xf32, #tpu.memory_space<vmem>>, vector<1x1x32xf32>
    %342 = vector.shape_cast %341 : vector<1x1x32xf32> to vector<1x32xf32>
    %343 = arith.index_cast %c1_i32 : i32 to index
    %c0_121 = arith.constant 0 : index
    %c0_122 = arith.constant 0 : index
    %344 = vector.load %arg14[%343, %c0_121, %c0_122] : memref<2x1x32xf32, #tpu.memory_space<vmem>>, vector<1x1x32xf32>
    %345 = vector.shape_cast %344 : vector<1x1x32xf32> to vector<1x32xf32>
    %cst_123 = arith.constant dense<0.000000e+00> : vector<8xf32>
    %346 = vector.multi_reduction <add>, %339, %cst_123 [1] : vector<8x32xf32> to vector<8xf32>
    %347 = vector.shape_cast %346 : vector<8xf32> to vector<8x1xf32>
    %cst_124 = arith.constant 3.200000e+01 : f32
    %348 = vector.broadcast %cst_124 : f32 to vector<8x1xf32>
    %349 = arith.divf %347, %348 : vector<8x1xf32>
    %350 = vector.broadcast %349 : vector<8x1xf32> to vector<8x32xf32>
    %351 = arith.subf %339, %350 : vector<8x32xf32>
    %352 = arith.mulf %351, %351 : vector<8x32xf32>
    %cst_125 = arith.constant dense<0.000000e+00> : vector<8xf32>
    %353 = vector.multi_reduction <add>, %352, %cst_125 [1] : vector<8x32xf32> to vector<8xf32>
    %354 = vector.shape_cast %353 : vector<8xf32> to vector<8x1xf32>
    %cst_126 = arith.constant 3.200000e+01 : f32
    %355 = vector.broadcast %cst_126 : f32 to vector<8x1xf32>
    %356 = arith.divf %354, %355 : vector<8x1xf32>
    %357 = vector.broadcast %349 : vector<8x1xf32> to vector<8x32xf32>
    %358 = arith.subf %339, %357 : vector<8x32xf32>
    %cst_127 = arith.constant 9.99999974E-6 : f32
    %359 = vector.broadcast %cst_127 : f32 to vector<8x1xf32>
    %360 = arith.addf %356, %359 : vector<8x1xf32>
    %361 = math.rsqrt %360 : vector<8x1xf32>
    %362 = vector.broadcast %361 : vector<8x1xf32> to vector<8x32xf32>
    %363 = arith.mulf %358, %362 : vector<8x32xf32>
    %364 = vector.broadcast %342 : vector<1x32xf32> to vector<8x32xf32>
    %365 = arith.mulf %363, %364 : vector<8x32xf32>
    %366 = vector.broadcast %345 : vector<1x32xf32> to vector<8x32xf32>
    %367 = arith.addf %365, %366 : vector<8x32xf32>
    %c2_i32 = arith.constant 2 : i32
    %c0_128 = arith.constant 0 : index
    %c0_129 = arith.constant 0 : index
    %c0_130 = arith.constant 0 : index
    %368 = vector.load %arg15[%c0_128, %c0_129, %c0_130] : memref<1x8x32xf32, #tpu.memory_space<vmem>>, vector<1x8x32xf32>
    %369 = vector.shape_cast %368 : vector<1x8x32xf32> to vector<8x32xf32>
    %370 = vector.shape_cast %367 : vector<8x32xf32> to vector<1x8x32xf32>
    tpu.vector_store %arg15[%c0_128, %c0_129, %c0_130], %370 {strides = array<i32>} : memref<1x8x32xf32, #tpu.memory_space<vmem>>, vector<1x8x32xf32>,
    return
  }
  func.func @transform_0(%arg0: i32) -> (i32, i32, i32) {
    %c0_i32 = arith.constant 0 : i32
    %c0_i32_0 = arith.constant 0 : i32
    %c0_i32_1 = arith.constant 0 : i32
    return %arg0, %c0_i32, %c0_i32_0 : i32, i32, i32
  }
  func.func @transform_1(%arg0: i32) -> (i32, i32, i32) {
    %c0_i32 = arith.constant 0 : i32
    %c0_i32_0 = arith.constant 0 : i32
    %c0_i32_1 = arith.constant 0 : i32
    return %arg0, %c0_i32, %c0_i32_0 : i32, i32, i32
  }
  func.func @transform_2(%arg0: i32) -> (i32, i32, i32) {
    %c0_i32 = arith.constant 0 : i32
    %c0_i32_0 = arith.constant 0 : i32
    %c0_i32_1 = arith.constant 0 : i32
    %c0_i32_2 = arith.constant 0 : i32
    return %c0_i32, %c0_i32_0, %c0_i32_1 : i32, i32, i32
  }
  func.func @transform_3(%arg0: i32) -> (i32, i32, i32) {
    %c0_i32 = arith.constant 0 : i32
    %c0_i32_0 = arith.constant 0 : i32
    %c0_i32_1 = arith.constant 0 : i32
    %c0_i32_2 = arith.constant 0 : i32
    return %c0_i32, %c0_i32_0, %c0_i32_1 : i32, i32, i32
  }
  func.func @transform_4(%arg0: i32) -> (i32, i32, i32) {
    %c0_i32 = arith.constant 0 : i32
    %c0_i32_0 = arith.constant 0 : i32
    %c0_i32_1 = arith.constant 0 : i32
    %c0_i32_2 = arith.constant 0 : i32
    return %c0_i32, %c0_i32_0, %c0_i32_1 : i32, i32, i32
  }
  func.func @transform_5(%arg0: i32) -> (i32, i32, i32) {
    %c0_i32 = arith.constant 0 : i32
    %c0_i32_0 = arith.constant 0 : i32
    %c0_i32_1 = arith.constant 0 : i32
    %c0_i32_2 = arith.constant 0 : i32
    return %c0_i32, %c0_i32_0, %c0_i32_1 : i32, i32, i32
  }
  func.func @transform_6(%arg0: i32) -> (i32, i32, i32) {
    %c0_i32 = arith.constant 0 : i32
    %c0_i32_0 = arith.constant 0 : i32
    %c0_i32_1 = arith.constant 0 : i32
    %c0_i32_2 = arith.constant 0 : i32
    return %c0_i32, %c0_i32_0, %c0_i32_1 : i32, i32, i32
  }
  func.func @transform_7(%arg0: i32) -> (i32, i32, i32) {
    %c0_i32 = arith.constant 0 : i32
    %c0_i32_0 = arith.constant 0 : i32
    %c0_i32_1 = arith.constant 0 : i32
    %c0_i32_2 = arith.constant 0 : i32
    return %c0_i32, %c0_i32_0, %c0_i32_1 : i32, i32, i32
  }
  func.func @transform_8(%arg0: i32) -> (i32, i32, i32) {
    %c0_i32 = arith.constant 0 : i32
    %c0_i32_0 = arith.constant 0 : i32
    %c0_i32_1 = arith.constant 0 : i32
    %c0_i32_2 = arith.constant 0 : i32
    return %c0_i32, %c0_i32_0, %c0_i32_1 : i32, i32, i32
  }
  func.func @transform_9(%arg0: i32) -> (i32, i32, i32) {
    %c0_i32 = arith.constant 0 : i32
    %c0_i32_0 = arith.constant 0 : i32
    %c0_i32_1 = arith.constant 0 : i32
    %c0_i32_2 = arith.constant 0 : i32
    return %c0_i32, %c0_i32_0, %c0_i32_1 : i32, i32, i32
  }
  func.func @transform_10(%arg0: i32) -> (i32, i32, i32) {
    %c0_i32 = arith.constant 0 : i32
    %c0_i32_0 = arith.constant 0 : i32
    %c0_i32_1 = arith.constant 0 : i32
    %c0_i32_2 = arith.constant 0 : i32
    return %c0_i32, %c0_i32_0, %c0_i32_1 : i32, i32, i32
  }
  func.func @transform_11(%arg0: i32) -> (i32, i32, i32) {
    %c0_i32 = arith.constant 0 : i32
    %c0_i32_0 = arith.constant 0 : i32
    %c0_i32_1 = arith.constant 0 : i32
    %c0_i32_2 = arith.constant 0 : i32
    return %c0_i32, %c0_i32_0, %c0_i32_1 : i32, i32, i32
  }
  func.func @transform_12(%arg0: i32) -> (i32, i32, i32) {
    %c0_i32 = arith.constant 0 : i32
    %c0_i32_0 = arith.constant 0 : i32
    %c0_i32_1 = arith.constant 0 : i32
    %c0_i32_2 = arith.constant 0 : i32
    return %c0_i32, %c0_i32_0, %c0_i32_1 : i32, i32, i32
  }
  func.func @transform_13(%arg0: i32) -> (i32, i32, i32) {
    %c0_i32 = arith.constant 0 : i32
    %c0_i32_0 = arith.constant 0 : i32
    %c0_i32_1 = arith.constant 0 : i32
    %c0_i32_2 = arith.constant 0 : i32
    return %c0_i32, %c0_i32_0, %c0_i32_1 : i32, i32, i32
  }
  func.func @transform_14(%arg0: i32) -> (i32, i32, i32) {
    %c0_i32 = arith.constant 0 : i32
    %c0_i32_0 = arith.constant 0 : i32
    %c0_i32_1 = arith.constant 0 : i32
    return %arg0, %c0_i32, %c0_i32_0 : i32, i32, i32
  }
}

</mosaic_0001>

<bundles_post_ra>
// kernel: tpu_custom_call.1
= control target key start
LH: loop header
LB: loop body
LE: loop exit
PB: predicated region body
PF: predicated region fallthrough
CT: control target
= control target key end

     0   :  { %s4077_s0 = inlined_call_operand.vmem [shape: f32[2,1,8], index: 0, kind: input, shape index: {}]   ;;  %s4078_s1 = inlined_call_operand.vmem [shape: f32[2,8,32], index: 1, kind: input, shape index: {}]   ;;  %s4079_s2 = inlined_call_operand.vmem [shape: f32[2,32,96], index: 2, kind: input, shape index: {}]   ;;  %s4080_s3 = inlined_call_operand.vmem [shape: f32[2,1,96], index: 3, kind: input, shape index: {}]   ;;  %s4081_s4 = inlined_call_operand.vmem [shape: f32[2,32,32], index: 4, kind: input, shape index: {}]   ;;  %s4082_s5 = inlined_call_operand.vmem [shape: f32[2,1,32], index: 5, kind: input, shape index: {}]   ;;  %s4083_s6 = inlined_call_operand.vmem [shape: f32[2,1,32], index: 6, kind: input, shape index: {}]   ;;  %s4084_s7 = inlined_call_operand.vmem [shape: f32[2,1,32], index: 7, kind: input, shape index: {}]   ;;  %s4085_s8 = inlined_call_operand.vmem [shape: f32[2,32,128], index: 8, kind: input, shape index: {}]   ;;  %s4086_s9 = inlined_call_operand.vmem [shape: f32[2,1,128], index: 9, kind: input, shape index: {}]   ;;  %s4087_s10 = inlined_call_operand.vmem [shape: f32[2,128,32], index: 10, kind: input, shape index: {}]   ;;  %s4088_s11 = inlined_call_operand.vmem [shape: f32[2,1,32], index: 11, kind: input, shape index: {}]   ;;  %s4089_s12 = inlined_call_operand.vmem [shape: f32[2,1,32], index: 12, kind: input, shape index: {}]   ;;  %s4090_s13 = inlined_call_operand.vmem [shape: f32[2,1,32], index: 13, kind: input, shape index: {}]   ;;  %s4091_s14 = inlined_call_operand.hbm [shape: f32[2,8,32], index: 14, kind: output, shape index: {}]  }
   0x1   :  { %4106 = sst [smem:[#allocation6_spill]] %s4077_s0 }
   0x2   :  { %4107 = sst [smem:[#allocation7_spill]] %s4078_s1 }
   0x3   :  { %4108 = sst [smem:[#allocation8_spill]] %s4079_s2 }
   0x4   :  { %4109 = sst [smem:[#allocation9_spill]] %s4080_s3 }
   0x5   :  { %19 = vsyncpa [#allocation3], 0 }
   0x6   :  { %21 = vsyncpa [#allocation3 + $0x1], 0  ;;  %s3524_s29 = smov 0   ;;  %s3526_s30 = smov 0  }
   0x7   :  { %s3528_s15 = smov 0   ;;  %s3530_s16 = smov 0  }
   0x8 LB: > { %s3545_s17 = sadd.s32 4294967295, %s3428_s16   ;;  %s2776_s18 = sadd.s32 4294967294, %s3428_s16   ;;  %s3428_s16 = sphi %s3530_s16, %s4135_s16   ;;  %s3424_s15 = sphi %s3528_s15, %s4134_s15   ;;  %s3420_s30 = sphi %s3526_s30, %s4133_s30   ;;  %s3416_s29 = sphi %s3524_s29, %s4132_s29  }
   0x9   : > { %s3549_s19 = sadd.s32 1, %s3428_s16   ;;  %s338_s20 = sadd.s32 1, %s3424_s15 }
   0xa   : > { %s335_s21 = ssub.s32 %s3428_s16, %s3549_s19  ;;  %p348_p0 = scmp.ne.s32.totalorder %s3424_s15, %s3420_s30 }
   0xb   : > { %p336_p1 = scmp.eq.s32.totalorder %s335_s21, 0  ;;  %p349_p2 = scmp.eq.s32.totalorder %s3545_s17, 1 }
   0xc   : > { %p354_p3 = scmp.ne.s32.totalorder %s3420_s30, %s3416_s29  ;;  %p355_p4 = scmp.eq.s32.totalorder %s2776_s18, 1 }
   0xd   : > { %s3560_s22 = scalar_select %p336_p1, %s3424_s15, %s338_s20  }
   0xe   : > { %p3562_p5 = por %p349_p2, %p348_p0  ;;  %p3566_p6 = por %p355_p4, %p354_p3 }
   0xf   : > { %4110 = sst [smem:[#allocation5_spill]] %s3560_s22  ;;  %p2779_p7 = scmp.ge.s32.totalorder %s3428_s16, 1 }
  0x10   : > { %p422_p8 = scmp.lt.s32.totalorder %s3428_s16, 3 }
  0x12   : > { %p423_p9 = pnand %p2779_p7, %p422_p8 }
  0x13   : > { %s4113_s2 = sld [smem:[#allocation8_spill]] (!%p423_p9)  ;;  %v3430_v3 = vmov (!%p423_p9), 0.0|0.0   ;;  %vm3431_vm0 = vmmov (!%p423_p9), 0   ;;  %v3432_v6 = vmov (!%p423_p9), 0.0   ;;  %p470_p10 = scmp.lt.s32.totalorder (!%p423_p9), %s3545_s17, 1  ;;  %vm503_vm1 = vcmask (!%p423_p9), 261120  }
  0x14   : > { %426 = sbr.rel (%p423_p9) target bundleno = 6136 (0x17f8), region = 76  ;;  %3181 = vmatprep.subr.bf16.mxu1 (!%p423_p9), %v3430_v3  ;;  %2973 = vmatprep.mubr.msk.f32.mxu1 (!%p423_p9), %vm3431_vm0, %v3432_v6  ;;  %s4114_s1 = sld [smem:[#allocation7_spill]] (!%p423_p9)  ;;  %vm580_vm2 = vcmask (!%p423_p9), 64512   ;;  %v477_v20 = vlaneseq (!%p423_p9)  ;;  %v3440_v23 = vmov (!%p423_p9), -1e+09   ;;  %vm1258_vm4 = vcmask (!%p423_p9), 130048  }
  0x15   : > { %2986 = vmatprep.subr.mxu0 (!%p423_p9), %v3432_v6  ;;  %2988 = vmatprep.mubr.msk.f32.mxu0 (!%p423_p9), %vm3431_vm0, %v3432_v6  ;;  %s4115_s3 = sld [smem:[#allocation9_spill]] (!%p423_p9)  ;;  %s4100_s21 = smov (!%p423_p9), 120   ;;  %vm1260_vm5 = vcmask (!%p423_p9), 195584  }
  0x16   : > { %s4093_s26 = smov (!%p423_p9), 80   ;;  %s4101_s27 = smov (!%p423_p9), 88   ;;  %v478_v21 = vshrl.u32 (!%p423_p9), %v477_v20, 7  ;;  %v480_v22 = vand.u32 (!%p423_p9), 127, %v477_v20 }
  0x17   : > { %s4097_s18 = smov (!%p423_p9), 112   ;;  %s4092_s20 = smov (!%p423_p9), 104  }
  0x18   : > { %s4116_s0 = sld [smem:[#allocation6_spill]] (!%p423_p9)  ;;  %vm481_vm3 = vcmp.le.s32.totalorder (!%p423_p9), %v480_v22, %v478_v21  ;;  %v1262_v22 = vld [vmem:[%s4081_s4] sm:$0xff] (!%p423_p9) }
  0x19   : > { %v492_v0 = vld [vmem:[%s4113_s2] sm:$0xff] (!%p423_p9)  ;;  %v493_v1 = vld [vmem:[%s4113_s2 + $0x8] sm:$0xff] (!%p423_p9)  ;;  %v494_v2 = vld [vmem:[%s4113_s2 + $0x10] sm:$0xff] (!%p423_p9)  ;;  %v482_v24 = vsel (!%p423_p9), %vm481_vm3, 0.0, %v3440_v23 }
  0x1a   : > { %v3182_v4 = vpack.c.bf16 (!%p423_p9), %v493_v1, %v492_v0  ;;  %v495_v5 = vld [vmem:[%s4113_s2 + $0x18] sm:$0xff] (!%p423_p9)  ;;  %v1263_v23 = vld [vmem:[%s4081_s4 + $0x8] sm:$0xff] (!%p423_p9) }
  0x1b   : > { %v3185_v7 = vpack.c.bf16 %v495_v5, %v494_v2  ;;  %s3592_s25 = scalar_select %p470_p10, %s3545_s17, 1  ;;  %v2783_v9 = vld [vmem:[%s4115_s3] ss:$0 sm:$0xff] }
  0x1c   : > { %3183 = vmatpush3.bf16.msra.mxu1 %v3182_v4 }
  0x1d   : > { %3184 = vmatprep.subr.bf16.mxu1 %v3430_v3  ;;  %s2781_s22 = sshll.u32 %s3592_s25, 3 }
  0x1e   : > { %s476_s28 = scalar_lea.vmem %s4114_s1, %s2781_s22  ;;  %s4105_s22 = smov 96  }
  0x1f   : > { %v3599_v8 = vld [vmem:[%s476_s28] sm:$0xff]  ;;  %s4094_s28 = smov 72  }
  0x20   : > { %3186 = vmatpush3.bf16.msra.mxu1 %v3185_v7 }
  0x21   : > { %2976 = vmatprep.subr.mxu1 %v3432_v6 }
  0x23   : > { %2974 = vmatmul.mubr.msk.f32.vlgmr.msra.gmra.mrb[0].mxu1 %vm503_vm1, %v3599_v8 }
  0x24   : > { %2978 = vmatprep.mubr.msk.f32.mxu1 %vm3431_vm0, %v3432_v6 }
  0xf6   : > { %v573_v10 = vpop.f32.mrb[0].mxu1 }
  0xf7   : > { %v3609_v11 = vadd.f32 %v2783_v9, %v573_v10  ;;  %v2975_v12 = vpop.f32.mrb[1].mxu1 }
  0xf9   : > { %744 = vrot.lane.b32.xlu1 %v3609_v11, %s4100_s21  ;;  %578 = vrot.lane.b32.xlu0 %v3609_v11, %s4105_s22  ;;  %s4119_s21 = smov 120   ;;  %s4124_s22 = smov 80  }
  0xfd   : > { %913 = vrot.lane.b32.xlu1 %v3609_v11, %s4093_s26  ;;  %746 = vrot.lane.b32.xlu0 %v3609_v11, %s4101_s27  ;;  %s4099_s26 = smov 64   ;;  %s4120_s27 = smov 64  }
 0x101   : > { %1080 = vrot.lane.b32.xlu1 %v3609_v11, %s4094_s28  ;;  %911 = vrot.lane.b32.xlu0 %v3609_v11, %s4097_s18  ;;  %s472_s28 = scalar_lea.vmem %s4116_s0, %s3592_s25  ;;  %s4098_s25 = smov 56  }
 0x102   : > { %v2782_v25 = vld [vmem:[%s472_s28] ss:$0 sm:$0xff]  ;;  %s4095_s28 = smov 48   ;;  %s4103_s18 = smov 16  }
 0x103   : > { %v3650_v26 = vadd.f32 %v2782_v25, %v482_v24  ;;  %v3188_v24 = vpack.c.bf16 %v1263_v23, %v1262_v22  ;;  %v1476_v22 = vld [vmem:[%s4087_s10 + $0x50] sm:$0xff]  ;;  %v1477_v23 = vld [vmem:[%s4087_s10 + $0x58] sm:$0xff]  ;;  %s4122_s0 = smov 112  }
 0x105   : > { %1078 = vrot.lane.b32.xlu0 %v3609_v11, %s4092_s20  ;;  %s4096_s20 = smov 40  }
 0x16b   : > { %v745_v13 = vpop.permute.xlu1 %744  ;;  %v579_v14 = vpop.permute.xlu0 %578 }
 0x16c   : > { %2977 = vmatpush3.xpose.msk.msra.mxu1 %vm580_vm2, %v579_v14 }
 0x16d   : > { %2981 = vmatprep.subr.mxu1 %v3432_v6 }
 0x16f   : > { %2979 = vmatmul.mubr.msk.f32.vlgmr.msra.gmra.mrb[2].mxu1 %vm580_vm2, %v3609_v11  ;;  %v747_v15 = vpop.permute.xlu0 %746  ;;  %v914_v16 = vpop.permute.xlu1 %913 }
 0x170   : > { %2987 = vmatpush3.xpose.msk.msra.mxu0 %vm580_vm2, %v747_v15  ;;  %2983 = vmatprep.mubr.msk.f32.mxu1 %vm3431_vm0, %v3432_v6 }
 0x171   : > { %2996 = vmatprep.subr.mxu0 %v3432_v6 }
 0x173   : > { %2989 = vmatmul.mubr.msk.f32.vlgmr.msra.gmra.mrb[0].mxu0 %vm580_vm2, %v745_v13  ;;  %v912_v17 = vpop.permute.xlu0 %911  ;;  %v1081_v18 = vpop.permute.xlu1 %1080 }
 0x174   : > { %2997 = vmatpush3.xpose.msk.msra.mxu0 %vm580_vm2, %v914_v16  ;;  %2998 = vmatprep.mubr.msk.f32.mxu0 %vm3431_vm0, %v3432_v6 }
 0x175   : > { %3006 = vmatprep.subr.mxu0 %v3432_v6 }
 0x177   : > { %2999 = vmatmul.mubr.msk.f32.vlgmr.msra.gmra.mrb[2].mxu0 %vm580_vm2, %v912_v17  ;;  %v1079_v19 = vpop.permute.xlu0 %1078 }
 0x178   : > { %3007 = vmatpush3.xpose.msk.msra.mxu0 %vm580_vm2, %v1081_v18  ;;  %3008 = vmatprep.mubr.msk.f32.mxu0 %vm3431_vm0, %v3432_v6 }
 0x179   : > { %3199 = vmatprep.subr.bf16.mxu0 %v3430_v3 }
 0x17b   : > { %3009 = vmatmul.mubr.msk.f32.vlgmr.msra.gmra.mrb[4].mxu0 %vm580_vm2, %v1079_v19 }
 0x17c   : > { %3070 = vmatprep.mubr.msk.f32.mxu0 %vm3431_vm0, %v3432_v6 }
 0x242   : > { %v651_v27 = vpop.f32.mrb[2].mxu1 }
 0x243   : > { %v655_v28 = vmul.f32 0.35355338, %v651_v27  ;;  %v2980_v29 = vpop.f32.mrb[3].mxu1 }
 0x245   : > { %v656_v30 = vadd.f32 %v655_v28, %v3650_v26 }
 0x246   : > { %v818_v31 = vpop.f32.mrb[0].mxu0 }
 0x247   : > { %v822_v32 = vmul.f32 0.35355338, %v818_v31  ;;  %v2990_v33 = vpop.f32.mrb[1].mxu0  ;;  %v657_v34 = vsel %vm580_vm2, %v656_v30, -inf  ;;  %v1265_v31 = vld [vmem:[%s4081_s4 + $0x18] sm:$0xff] }
 0x248   : > { %658 = vmax.xlane.f32.xlu1 %v657_v34 }
 0x249   : > { %v823_v35 = vadd.f32 %v822_v32, %v3650_v26 }
 0x24a   : > { %v985_v36 = vpop.f32.mrb[2].mxu0 }
 0x24b   : > { %v989_v37 = vmul.f32 0.35355338, %v985_v36  ;;  %v3000_v38 = vpop.f32.mrb[3].mxu0  ;;  %v824_v39 = vsel %vm580_vm2, %v823_v35, -inf }
 0x24c   : > { %825 = vmax.xlane.f32.xlu0 %v824_v39 }
 0x24d   : > { %v990_v40 = vadd.f32 %v989_v37, %v3650_v26 }
 0x24e   : > { %v1152_v41 = vpop.f32.mrb[4].mxu0 }
 0x24f   : > { %v1156_v42 = vmul.f32 0.35355338, %v1152_v41  ;;  %v3010_v43 = vpop.f32.mrb[5].mxu0  ;;  %v991_v44 = vsel %vm580_vm2, %v990_v40, -inf }
 0x250   : > { %992 = vmax.xlane.f32.xlu0 %v991_v44  ;;  %v2797_v43 = vld [vmem:[%s4082_s5] ss:$0 sm:$0xff] }
 0x251   : > { %v1157_v45 = vadd.f32 %v1156_v42, %v3650_v26 }
 0x253   : > { %v1158_v46 = vsel %vm580_vm2, %v1157_v45, -inf }
 0x254   : > { %1159 = vmax.xlane.f32.xlu1 %v1158_v46 }
 0x265   : > { %835 = vrot.lane.b32.xlu1 %v3609_v11, %s4098_s25  ;;  %s4102_s25 = smov 24  }
 0x2d5   : > { %v659_v47 = vpop.xlane.xlu1 %658 }
 0x2d6   : > { %v660_v48 = vsub.f32 %v656_v30, %v659_v47  ;;  %v1264_v30 = vld [vmem:[%s4081_s4 + $0x10] sm:$0xff] }
 0x2d7   : > { %v3191_v32 = vpack.c.bf16 %v1265_v31, %v1264_v30  ;;  %v1481_v30 = vld [vmem:[%s4087_s10 + $0x78] sm:$0xff] }
 0x2d8   : > { %v661_v49 = vmul.f32 1.442695, %v660_v48 }
 0x2d9   : > { %v826_v50 = vpop.xlane.xlu0 %825 }
 0x2da   : > { %3322 = vpow2.f32 %v661_v49  ;;  %v827_v51 = vsub.f32 %v823_v35, %v826_v50 }
 0x2dc   : > { %v828_v52 = vmul.f32 1.442695, %v827_v51 }
 0x2dd   : > { %v993_v62 = vpop.xlane.xlu0 %992 }
 0x2de   : > { %3324 = vpow2.f32 %v828_v52  ;;  %v994_v63 = vsub.f32 %v990_v40, %v993_v62 }
 0x2e0   : > { %v995_v0 = vmul.f32 1.442695, %v994_v63  ;;  %v1469_v63 = vld [vmem:[%s4087_s10 + $0x18] sm:$0xff] }
 0x2e1   : > { %v1160_v53 = vpop.xlane.xlu1 %1159 }
 0x2e2   : > { %v1161_v54 = vsub.f32 %v1157_v45, %v1160_v53 }
 0x2e4   : > { %v3323_v55 = vpop.eup %3322  ;;  %v1162_v56 = vmul.f32 1.442695, %v1161_v54  ;;  %v1377_v54 = vld [vmem:[%s4085_s8] sm:$0xff] }
 0x2e5   : > { %v663_v57 = vsel %vm580_vm2, %v3323_v55, 0.0  ;;  %v836_v4 = vpop.permute.xlu1 %835 }
 0x2e6   : > { %3326 = vpow2.f32 %v1162_v56  ;;  %664 = vadd.xlane.f32.xlu0 %v663_v57  ;;  %v1380_v57 = vld [vmem:[%s4085_s8 + $0x18] sm:$0xff] }
 0x2e7   : > { %3328 = vpow2.f32 %v995_v0 }
 0x2e8   : > { %v3325_v58 = vpop.eup %3324 }
 0x2e9   : > { %v830_v59 = vsel %vm580_vm2, %v3325_v58, 0.0 }
 0x2ea   : > { %831 = vadd.xlane.f32.xlu1 %v830_v59  ;;  %v1466_v59 = vld [vmem:[%s4087_s10] sm:$0xff] }
 0x2f0   : > { %v3327_v60 = vpop.eup %3326 }
 0x2f1   : > { %v1164_v61 = vsel %vm580_vm2, %v3327_v60, 0.0  ;;  %v3329_v1 = vpop.eup %3328 }
 0x2f2   : > { %1165 = vadd.xlane.f32.xlu1 %v1164_v61  ;;  %v997_v2 = vsel %vm580_vm2, %v3329_v1, 0.0  ;;  %v1468_v61 = vld [vmem:[%s4087_s10 + $0x10] sm:$0xff] }
 0x2f3   : > { %v3203_v0 = vpack.c.bf16 %v1469_v63, %v1468_v61  ;;  %v2804_v61 = vld [vmem:[%s4089_s12] ss:$0 sm:$0xff] }
 0x2f4   : > { %v2805_v63 = vld [vmem:[%s4090_s13] ss:$0 sm:$0xff] }
 0x2fc   : > { %668 = vrot.lane.b32.xlu0 %v3609_v11, %s4099_s26  ;;  %s4104_s26 = smov 8  }
 0x303   : > { %1002 = vrot.lane.b32.xlu1 %v3609_v11, %s4095_s28  ;;  %s4117_s28 = smov 96  }
 0x31b   : > { %998 = vadd.xlane.f32.xlu0 %v997_v2  ;;  %v1471_v2 = vld [vmem:[%s4087_s10 + $0x28] sm:$0xff] }
 0x331   : > { %1169 = vrot.lane.b32.xlu0 %v3609_v11, %s4096_s20  ;;  %s4118_s20 = smov 88  }
 0x373   : > { %v665_v5 = vpop.xlane.xlu0 %664 }
 0x374   : > { %3330 = vrcp.f32 %v665_v5 }
 0x377   : > { %v669_v7 = vpop.permute.xlu0 %668  ;;  %v832_v9 = vpop.xlane.xlu1 %831 }
 0x378   : > { %3332 = vrcp.f32 %v832_v9  ;;  %2982 = vmatpush3.msra.mxu1 %v669_v7 }
 0x379   : > { %2991 = vmatprep.subr.mxu1 %v3432_v6 }
 0x37e   : > { %v3331_v10 = vpop.eup %3330 }
 0x37f   : > { %v667_v12 = vmul.f32 %v3331_v10, %v3323_v55  ;;  %v1166_v13 = vpop.xlane.xlu1 %1165  ;;  %v1378_v55 = vld [vmem:[%s4085_s8 + $0x8] sm:$0xff] }
 0x380   : > { %v3194_v56 = vpack.c.bf16 %v1378_v55, %v1377_v54  ;;  %v2808_v55 = vld [vmem:[%s4113_s2 + $0x30] sm:$0xff] }
 0x381   : > { %2984 = vmatmul.mubr.msk.f32.vlgmr.msra.gmra.mrb[4].mxu1 %vm580_vm2, %v667_v12  ;;  %v2799_v12 = vld [vmem:[%s4083_s6] ss:$0 sm:$0xff] }
 0x382   : > { %v3333_v14 = vpop.eup %3332  ;;  %2992 = vmatpush3.msra.mxu1 %v836_v4  ;;  %2993 = vmatprep.mubr.msk.f32.mxu1 %vm3431_vm0, %v3432_v6 }
 0x383   : > { %v834_v11 = vmul.f32 %v3333_v14, %v3325_v58  ;;  %v1003_v15 = vpop.permute.xlu1 %1002  ;;  %3001 = vmatprep.subr.mxu1 %v3432_v6  ;;  %v2800_v14 = vld [vmem:[%s4084_s7] ss:$0 sm:$0xff] }
 0x385   : > { %2994 = vmatmul.mubr.msk.f32.vlgmr.msra.gmra.mrb[6].mxu1 %vm580_vm2, %v834_v11 }
 0x386   : > { %3002 = vmatpush3.msra.mxu1 %v1003_v15  ;;  %3003 = vmatprep.mubr.msk.f32.mxu1 %vm3431_vm0, %v3432_v6 }
 0x387   : > { %3011 = vmatprep.subr.mxu1 %v3432_v6 }
 0x3a8   : > { %v999_v16 = vpop.xlane.xlu0 %998 }
 0x3a9   : > { %3334 = vrcp.f32 %v999_v16  ;;  %v1472_v16 = vld [vmem:[%s4087_s10 + $0x30] sm:$0xff] }
 0x3aa   : > { %3336 = vrcp.f32 %v1166_v13 }
 0x3ac   : > { %v1170_v20 = vpop.permute.xlu0 %1169 }
 0x3b3   : > { %v3335_v17 = vpop.eup %3334 }
 0x3b4   : > { %v1001_v18 = vmul.f32 %v3335_v17, %v3329_v1  ;;  %v3337_v19 = vpop.eup %3336  ;;  %v1470_v1 = vld [vmem:[%s4087_s10 + $0x20] sm:$0xff]  ;;  %v1473_v17 = vld [vmem:[%s4087_s10 + $0x38] sm:$0xff] }
 0x3b5   : > { %v1168_v21 = vmul.f32 %v3337_v19, %v3327_v60  ;;  %v1467_v60 = vld [vmem:[%s4087_s10 + $0x8] sm:$0xff]  ;;  %v3206_v4 = vpack.c.bf16 %v1471_v2, %v1470_v1  ;;  %v1474_v19 = vld [vmem:[%s4087_s10 + $0x40] sm:$0xff] }
 0x3b6   : > { %3004 = vmatmul.mubr.msk.f32.vlgmr.msra.gmra.mrb[8].mxu1 %vm580_vm2, %v1001_v18  ;;  %v3200_v62 = vpack.c.bf16 %v1467_v60, %v1466_v59  ;;  %v3209_v18 = vpack.c.bf16 %v1473_v17, %v1472_v16  ;;  %v2811_v2 = vld [vmem:[%s4115_s3 + $0x1] ss:$0 sm:$0xff] }
 0x3b7   : > { %3012 = vmatpush3.msra.mxu1 %v1170_v20  ;;  %3013 = vmatprep.mubr.msk.f32.mxu1 %vm3431_vm0, %v3432_v6  ;;  %v1475_v20 = vld [vmem:[%s4087_s10 + $0x48] sm:$0xff] }
 0x3b8   : > { %3187 = vmatprep.subr.bf16.mxu1 %v3430_v3  ;;  %3201 = vmatpush3.bf16.msra.mxu0 %v3200_v62 }
 0x3b9   : > { %3202 = vmatprep.subr.bf16.mxu0 %v3430_v3 }
 0x3ba   : > { %3014 = vmatmul.mubr.msk.f32.vlgmr.msra.gmra.mrb[10].mxu1 %vm580_vm2, %v1168_v21  ;;  %v3212_v21 = vpack.c.bf16 %v1475_v20, %v1474_v19 }
 0x3bb   : > { %3024 = vmatprep.mubr.msk.f32.mxu1 %vm3431_vm0, %v3432_v6  ;;  %3189 = vmatpush3.bf16.msra.mxu1 %v3188_v24  ;;  %v3215_v24 = vpack.c.bf16 %v1477_v23, %v1476_v22 }
 0x3bc   : > { %3190 = vmatprep.subr.bf16.mxu1 %v3430_v3  ;;  %3204 = vmatpush3.bf16.msra.mxu0 %v3203_v0 }
 0x3bd   : > { %3205 = vmatprep.subr.bf16.mxu0 %v3430_v3 }
 0x3bf   : > { %3192 = vmatpush3.bf16.msra.mxu1 %v3191_v32  ;;  %v2801_v32 = vld [vmem:[%s4086_s9] ss:$0 sm:$0xff] }
 0x3c0   : > { %3193 = vmatprep.subr.bf16.mxu1 %v3430_v3  ;;  %3207 = vmatpush3.bf16.msra.mxu0 %v3206_v4 }
 0x3c1   : > { %3208 = vmatprep.subr.bf16.mxu0 %v3430_v3 }
 0x3c4   : > { %3210 = vmatpush3.bf16.msra.mxu0 %v3209_v18 }
 0x3c5   : > { %3211 = vmatprep.subr.bf16.mxu0 %v3430_v3 }
 0x3c8   : > { %3213 = vmatpush3.bf16.msra.mxu0 %v3212_v21 }
 0x3c9   : > { %3214 = vmatprep.subr.bf16.mxu0 %v3430_v3 }
 0x3cc   : > { %3216 = vmatpush3.bf16.msra.mxu0 %v3215_v24 }
 0x3cd   : > { %3217 = vmatprep.subr.bf16.mxu0 %v3430_v3 }
 0x454   : > { %v740_v25 = vpop.f32.mrb[4].mxu1 }
 0x455   : > { %v2985_v27 = vpop.f32.mrb[5].mxu1 }
 0x456   : > { %v1479_v27 = vld [vmem:[%s4087_s10 + $0x68] sm:$0xff] }
 0x458   : > { %v907_v28 = vpop.f32.mrb[6].mxu1 }
 0x459   : > { %1246 = vrot.lane.b32.xlu1 %v907_v28, %s4104_s26  ;;  %v2995_v29 = vpop.f32.mrb[7].mxu1  ;;  %s4125_s26 = smov 104  }
 0x45a   : > { %v1480_v29 = vld [vmem:[%s4087_s10 + $0x70] sm:$0xff] }
 0x45b   : > { %v3221_v31 = vpack.c.bf16 %v1481_v30, %v1480_v29 }
 0x489   : > { %v1074_v33 = vpop.f32.mrb[8].mxu1 }
 0x48a   : > { %1250 = vrot.lane.b32.xlu0 %v1074_v33, %s4103_s18  ;;  %v3005_v34 = vpop.f32.mrb[9].mxu1  ;;  %s4121_s18 = smov 56  }
 0x48d   : > { %v1241_v35 = vpop.f32.mrb[10].mxu1 }
 0x48e   : > { %1254 = vrot.lane.b32.xlu1 %v1241_v35, %s4102_s25  ;;  %v3015_v36 = vpop.f32.mrb[11].mxu1  ;;  %s4123_s25 = smov 72  }
 0x4cb   : > { %v1247_v37 = vpop.permute.xlu1 %1246 }
 0x4cc   : > { %v1257_v39 = vsel %vm580_vm2, %v740_v25, %v1247_v37  ;;  %v1478_v25 = vld [vmem:[%s4087_s10 + $0x60] sm:$0xff] }
 0x4cd   : > { %v3218_v28 = vpack.c.bf16 %v1479_v27, %v1478_v25 }
 0x4cf   : > { %3219 = vmatpush3.bf16.msra.mxu0 %v3218_v28 }
 0x4d0   : > { %3220 = vmatprep.subr.bf16.mxu0 %v3430_v3 }
 0x4d3   : > { %3222 = vmatpush3.bf16.msra.mxu0 %v3221_v31 }
 0x4d4   : > { %3114 = vmatprep.subr.mxu0 %v3432_v6 }
 0x4fc   : > { %v1251_v38 = vpop.permute.xlu0 %1250 }
 0x4fd   : > { %v1259_v40 = vsel %vm1258_vm4, %v1257_v39, %v1251_v38 }
 0x500   : > { %v1255_v41 = vpop.permute.xlu1 %1254 }
 0x501   : > { %v1261_v42 = vsel %vm1260_vm5, %v1259_v40, %v1255_v41  ;;  %v2803_v41 = vld [vmem:[%s4088_s11] ss:$0 sm:$0xff] }
 0x502   : > { %3025 = vmatmul.mubr.msk.f32.vlgmr.msra.gmra.mrb[12].mxu1 %vm503_vm1, %v1261_v42 }
 0x503   : > { %3035 = vmatprep.mubr.msk.f32.mxu1 %vm3431_vm0, %v3432_v6  ;;  %3195 = vmatpush3.bf16.msra.mxu1 %v3194_v56  ;;  %v2809_v56 = vld [vmem:[%s4113_s2 + $0x38] sm:$0xff] }
 0x504   : > { %3196 = vmatprep.subr.bf16.mxu1 %v3430_v3 }
 0x5d5   : > { %v1342_v44 = vpop.f32.mrb[12].mxu1 }
 0x5d6   : > { %v1343_v45 = vadd.f32 %v2797_v43, %v1342_v44  ;;  %v3026_v46 = vpop.f32.mrb[13].mxu1 }
 0x5d8   : > { %v1346_v47 = vadd.f32 %v1343_v45, %v3599_v8  ;;  %v1379_v8 = vld [vmem:[%s4085_s8 + $0x10] sm:$0xff] }
 0x5d9   : > { %v3197_v58 = vpack.c.bf16 %v1380_v57, %v1379_v8  ;;  %v3227_v8 = vpack.c.bf16 %v2809_v56, %v2808_v55 }
 0x5da   : > { %v1349_v48 = vsel %vm503_vm1, %v1346_v47, 0.0 }
 0x5db   : > { %1350 = vadd.xlane.f32.xlu0 %v1349_v48  ;;  %3198 = vmatpush3.bf16.msra.mxu1 %v3197_v58 }
 0x5dc   : > { %3223 = vmatprep.subr.bf16.mxu1 %v3430_v3 }
 0x668   : > { %v1351_v49 = vpop.xlane.xlu0 %1350 }
 0x669   : > { %v1353_v50 = vmul.f32 0.03125, %v1351_v49 }
 0x66b   : > { %v1354_v51 = vsub.f32 %v1346_v47, %v1353_v50 }
 0x66d   : > { %v1355_v52 = vmul.f32 %v1354_v51, %v1354_v51 }
 0x66f   : > { %v1356_v53 = vsel %vm503_vm1, %v1355_v52, 0.0  ;;  %v2806_v52 = vld [vmem:[%s4113_s2 + $0x20] sm:$0xff] }
 0x670   : > { %1357 = vadd.xlane.f32.xlu1 %v1356_v53  ;;  %v2807_v53 = vld [vmem:[%s4113_s2 + $0x28] sm:$0xff] }
 0x671   : > { %v3224_v54 = vpack.c.bf16 %v2807_v53, %v2806_v52 }
 0x6fd   : > { %v1358_v5 = vpop.xlane.xlu1 %1357 }
 0x6fe   : > { %v1359_v7 = vmul.f32 0.03125, %v1358_v5 }
 0x700   : > { %v1360_v9 = vadd.f32 1e-05, %v1359_v7 }
 0x702   : > { %3338 = vrsqrt.f32 %v1360_v9 }
 0x70c   : > { %v3339_v10 = vpop.eup %3338 }
 0x70d   : > { %v1362_v13 = vmul.f32 %v3339_v10, %v1354_v51 }
 0x70f   : > { %v1369_v11 = vmul.f32 %v2799_v12, %v1362_v13 }
 0x711   : > { %v1376_v15 = vadd.f32 %v2800_v14, %v1369_v11 }
 0x713   : > { %3036 = vmatmul.mubr.msk.f32.vlgmr.msra.gmra.mrb[14].mxu1 %vm503_vm1, %v1376_v15 }
 0x714   : > { %3081 = vmatprep.mubr.msk.f32.mxu1 %vm3431_vm0, %v3432_v6  ;;  %3225 = vmatpush3.bf16.msra.mxu1 %v3224_v54 }
 0x715   : > { %3226 = vmatprep.subr.bf16.mxu1 %v3430_v3 }
 0x718   : > { %3228 = vmatpush3.bf16.msra.mxu1 %v3227_v8 }
 0x719   : > { %3084 = vmatprep.subr.mxu1 %v3432_v6 }
 0x7e6   : > { %v1457_v33 = vpop.f32.mrb[14].mxu1 }
 0x7e7   : > { %v1458_v34 = vadd.f32 %v2801_v32, %v1457_v33  ;;  %v3037_v35 = vpop.f32.mrb[15].mxu1 }
 0x7e9   : > { %v1462_v36 = vmul.f32 0.70710677, %v1458_v34  ;;  %v1461_v38 = vmul.f32 0.5, %v1458_v34 }
 0x7eb   : > { %3340 = verf.f32 %v1462_v36 }
 0x7f5   : > { %v3341_v37 = vpop.eup %3340 }
 0x7f6   : > { %v1464_v39 = vadd.f32 1.0, %v3341_v37 }
 0x7f8   : > { %v1465_v40 = vmul.f32 %v1464_v39, %v1461_v38 }
 0x7fa   : > { %3071 = vmatmul.mubr.f32.vlgmr.msra.gmra.mrb[6].mxu0 %v1465_v40 }
 0x7fb   : > { %3116 = vmatprep.mubr.msk.f32.mxu0 %vm3431_vm0, %v3432_v6 }
 0x8cd   : > { %v1555_v42 = vpop.f32.mrb[6].mxu0 }
 0x8ce   : > { %v1556_v43 = vadd.f32 %v2803_v41, %v1555_v42  ;;  %v3072_v44 = vpop.f32.mrb[7].mxu0 }
 0x8d0   : > { %v1559_v45 = vadd.f32 %v1556_v43, %v1376_v15 }
 0x8d2   : > { %v1562_v46 = vsel %vm503_vm1, %v1559_v45, 0.0 }
 0x8d3   : > { %1563 = vadd.xlane.f32.xlu0 %v1562_v46 }
 0x960   : > { %v1564_v47 = vpop.xlane.xlu0 %1563 }
 0x961   : > { %v1565_v48 = vmul.f32 0.03125, %v1564_v47 }
 0x963   : > { %v1566_v49 = vsub.f32 %v1559_v45, %v1565_v48 }
 0x965   : > { %v1567_v50 = vmul.f32 %v1566_v49, %v1566_v49 }
 0x967   : > { %v1568_v51 = vsel %vm503_vm1, %v1567_v50, 0.0 }
 0x968   : > { %1569 = vadd.xlane.f32.xlu0 %v1568_v51 }
 0x9f5   : > { %v1570_v57 = vpop.xlane.xlu0 %1569 }
 0x9f6   : > { %v1571_v58 = vmul.f32 0.03125, %v1570_v57 }
 0x9f8   : > { %v1572_v59 = vadd.f32 1e-05, %v1571_v58 }
 0x9fa   : > { %3342 = vrsqrt.f32 %v1572_v59 }
 0xa04   : > { %v3343_v60 = vpop.eup %3342 }
 0xa05   : > { %v1574_v62 = vmul.f32 %v3343_v60, %v1566_v49 }
 0xa07   : > { %v1581_v0 = vmul.f32 %v2804_v61, %v1574_v62 }
 0xa09   : > { %v3826_v1 = vadd.f32 %v2805_v63, %v1581_v0 }
 0xa0b   : > { %3082 = vmatmul.mubr.msk.f32.vlgmr.msra.gmra.mrb[16].mxu1 %vm503_vm1, %v3826_v1 }
 0xa0c   : > { %3086 = vmatprep.mubr.msk.f32.mxu1 %vm3431_vm0, %v3432_v6 }
 0xade   : > { %v1671_v4 = vpop.f32.mrb[16].mxu1 }
 0xadf   : > { %v3835_v5 = vadd.f32 %v2811_v2, %v1671_v4  ;;  %v3083_v7 = vpop.f32.mrb[17].mxu1 }
 0xae1   : > { %1676 = vrot.lane.b32.xlu1 %v3835_v5, %s4117_s28  ;;  %s4126_s28 = smov 40  }
 0xae5   : > { %1843 = vrot.lane.b32.xlu1 %v3835_v5, %s4118_s20  ;;  %s4127_s20 = smov 8  }
 0xae9   : > { %1841 = vrot.lane.b32.xlu1 %v3835_v5, %s4119_s21  ;;  %s4128_s21 = smov 48  }
 0xb53   : > { %v1677_v9 = vpop.permute.xlu1 %1676 }
 0xb54   : > { %3085 = vmatpush3.xpose.msk.msra.mxu1 %vm580_vm2, %v1677_v9 }
 0xb55   : > { %3089 = vmatprep.subr.mxu1 %v3432_v6 }
 0xb57   : > { %3087 = vmatmul.mubr.msk.f32.vlgmr.msra.gmra.mrb[18].mxu1 %vm580_vm2, %v3835_v5  ;;  %v1844_v23 = vpop.permute.xlu1 %1843 }
 0xb58   : > { %3091 = vmatprep.mubr.msk.f32.mxu1 %vm3431_vm0, %v3432_v6 }
 0xb5b   : > { %v1842_v25 = vpop.permute.xlu1 %1841 }
 0xc2a   : > { %v1748_v10 = vpop.f32.mrb[18].mxu1 }
 0xc2b   : > { %v1752_v12 = vmul.f32 0.35355338, %v1748_v10  ;;  %v3088_v13 = vpop.f32.mrb[19].mxu1 }
 0xc2d   : > { %v1753_v14 = vadd.f32 %v1752_v12, %v3650_v26 }
 0xc2f   : > { %v1754_v11 = vsel %vm580_vm2, %v1753_v14, -inf }
 0xc30   : > { %1755 = vmax.xlane.f32.xlu0 %v1754_v11 }
 0xcbd   : > { %v1756_v15 = vpop.xlane.xlu0 %1755 }
 0xcbe   : > { %v1757_v16 = vsub.f32 %v1753_v14, %v1756_v15 }
 0xcc0   : > { %v1758_v17 = vmul.f32 1.442695, %v1757_v16  ;;  %v2826_v16 = vld [vmem:[%s4081_s4 + $0x28] sm:$0xff] }
 0xcc2   : > { %3344 = vpow2.f32 %v1758_v17 }
 0xccc   : > { %v3345_v18 = vpop.eup %3344 }
 0xccd   : > { %v1760_v19 = vsel %vm580_vm2, %v3345_v18, 0.0 }
 0xcce   : > { %1761 = vadd.xlane.f32.xlu0 %v1760_v19  ;;  %v2828_v19 = vld [vmem:[%s4081_s4 + $0x38] sm:$0xff] }
 0xce4   : > { %1765 = vrot.lane.b32.xlu0 %v3835_v5, %s4120_s27  ;;  %s4130_s27 = smov 24  }
 0xd5b   : > { %v1762_v20 = vpop.xlane.xlu0 %1761 }
 0xd5c   : > { %3346 = vrcp.f32 %v1762_v20 }
 0xd5f   : > { %v1766_v21 = vpop.permute.xlu0 %1765 }
 0xd60   : > { %3090 = vmatpush3.msra.mxu1 %v1766_v21 }
 0xd61   : > { %3094 = vmatprep.subr.mxu1 %v3432_v6 }
 0xd66   : > { %v3347_v22 = vpop.eup %3346 }
 0xd67   : > { %v1764_v24 = vmul.f32 %v3347_v22, %v3345_v18  ;;  %v2827_v18 = vld [vmem:[%s4081_s4 + $0x30] sm:$0xff] }
 0xd68   : > { %v3233_v20 = vpack.c.bf16 %v2828_v19, %v2827_v18  ;;  %v2841_v18 = vld [vmem:[%s4086_s9 + $0x1] ss:$0 sm:$0xff] }
 0xd69   : > { %3092 = vmatmul.mubr.msk.f32.vlgmr.msra.gmra.mrb[20].mxu1 %vm580_vm2, %v1764_v24 }
 0xd6a   : > { %3095 = vmatpush3.xpose.msk.msra.mxu1 %vm580_vm2, %v1844_v23  ;;  %3096 = vmatprep.mubr.msk.f32.mxu1 %vm3431_vm0, %v3432_v6 }
 0xd6b   : > { %3099 = vmatprep.subr.mxu1 %v3432_v6 }
 0xd6d   : > { %3097 = vmatmul.mubr.msk.f32.vlgmr.msra.gmra.mrb[22].mxu1 %vm580_vm2, %v1842_v25 }
 0xd6e   : > { %3101 = vmatprep.mubr.msk.f32.mxu1 %vm3431_vm0, %v3432_v6 }
 0xe3c   : > { %v3863_v27 = vpop.f32.mrb[20].mxu1 }
 0xe3d   : > { %v3093_v28 = vpop.f32.mrb[21].mxu1 }
 0xe40   : > { %v1915_v29 = vpop.f32.mrb[22].mxu1 }
 0xe41   : > { %v1919_v30 = vmul.f32 0.35355338, %v1915_v29  ;;  %v3098_v31 = vpop.f32.mrb[23].mxu1 }
 0xe43   : > { %v1920_v32 = vadd.f32 %v1919_v30, %v3650_v26 }
 0xe45   : > { %v1921_v33 = vsel %vm580_vm2, %v1920_v32, -inf }
 0xe46   : > { %1922 = vmax.xlane.f32.xlu1 %v1921_v33  ;;  %v2830_v33 = vld [vmem:[%s4082_s5 + $0x1] ss:$0 sm:$0xff] }
 0xe57   : > { %1932 = vrot.lane.b32.xlu1 %v3835_v5, %s4121_s18 }
 0xe5b   : > { %2008 = vrot.lane.b32.xlu1 %v3835_v5, %s4122_s0  ;;  %s467_s0 = sand.u32 1, %s3420_s30  }
 0xe5c   : > { %s2695_s1 = scalar_lea.sflag [#allocation3], %s467_s0 }
 0xe5f   : > { %2177 = vrot.lane.b32.xlu1 %v3835_v5, %s4123_s25  ;;  %s2780_s25 = sshll.u32 %s467_s0, 3 }
 0xed3   : > { %v1923_v34 = vpop.xlane.xlu1 %1922 }
 0xed4   : > { %v1924_v35 = vsub.f32 %v1920_v32, %v1923_v34 }
 0xed6   : > { %v1925_v36 = vmul.f32 1.442695, %v1924_v35 }
 0xed7   : > { %v1933_v37 = vpop.permute.xlu1 %1932 }
 0xed8   : > { %3348 = vpow2.f32 %v1925_v36  ;;  %3100 = vmatpush3.msra.mxu1 %v1933_v37 }
 0xed9   : > { %3104 = vmatprep.subr.mxu1 %v3432_v6 }
 0xedb   : > { %v2009_v38 = vpop.permute.xlu1 %2008 }
 0xedf   : > { %v2178_v39 = vpop.permute.xlu1 %2177 }
 0xee0   : > { %3115 = vmatpush3.xpose.msk.msra.mxu0 %vm580_vm2, %v2178_v39 }
 0xee1   : > { %3229 = vmatprep.subr.bf16.mxu0 %v3430_v3 }
 0xee2   : > { %v3349_v40 = vpop.eup %3348 }
 0xee3   : > { %v1927_v41 = vsel %vm580_vm2, %v3349_v40, 0.0 }
 0xee4   : > { %1928 = vadd.xlane.f32.xlu0 %v1927_v41 }
 0xefa   : > { %2010 = vrot.lane.b32.xlu0 %v3835_v5, %s4124_s22 }
 0xefe   : > { %2175 = vrot.lane.b32.xlu0 %v3835_v5, %s4125_s26 }
 0xf71   : > { %v1929_v42 = vpop.xlane.xlu0 %1928 }
 0xf72   : > { %3350 = vrcp.f32 %v1929_v42 }
 0xf75   : > { %v2011_v43 = vpop.permute.xlu0 %2010 }
 0xf79   : > { %v2176_v44 = vpop.permute.xlu0 %2175 }
 0xf7a   : > { %3117 = vmatmul.mubr.msk.f32.vlgmr.msra.gmra.mrb[8].mxu0 %vm580_vm2, %v2176_v44 }
 0xf7b   : > { %3132 = vmatprep.mubr.msk.f32.mxu0 %vm3431_vm0, %v3432_v6 }
 0xf7c   : > { %v3351_v45 = vpop.eup %3350 }
 0xf7d   : > { %v1931_v46 = vmul.f32 %v3351_v45, %v3349_v40  ;;  %v2839_v45 = vld [vmem:[%s4085_s8 + $0x38] sm:$0xff] }
 0xf7f   : > { %3102 = vmatmul.mubr.msk.f32.vlgmr.msra.gmra.mrb[24].mxu1 %vm580_vm2, %v1931_v46 }
 0xf80   : > { %3105 = vmatpush3.xpose.msk.msra.mxu1 %vm580_vm2, %v2011_v43  ;;  %3106 = vmatprep.mubr.msk.f32.mxu1 %vm3431_vm0, %v3432_v6  ;;  %v2837_v43 = vld [vmem:[%s4085_s8 + $0x28] sm:$0xff] }
 0xf81   : > { %3109 = vmatprep.subr.mxu1 %v3432_v6 }
 0xf83   : > { %3107 = vmatmul.mubr.msk.f32.vlgmr.msra.gmra.mrb[26].mxu1 %vm580_vm2, %v2009_v38 }
 0xf84   : > { %3111 = vmatprep.mubr.msk.f32.mxu1 %vm3431_vm0, %v3432_v6 }
0x104d   : > { %v2249_v47 = vpop.f32.mrb[8].mxu0 }
0x104e   : > { %v2253_v48 = vmul.f32 0.35355338, %v2249_v47  ;;  %v3118_v49 = vpop.f32.mrb[9].mxu0  ;;  %v2843_v47 = vld [vmem:[%s4087_s10 + $0x80] sm:$0xff] }
0x104f   : > { %v2845_v49 = vld [vmem:[%s4087_s10 + $0x90] sm:$0xff] }
0x1050   : > { %v2254_v50 = vadd.f32 %v2253_v48, %v3650_v26  ;;  %v2844_v48 = vld [vmem:[%s4087_s10 + $0x88] sm:$0xff] }
0x1052   : > { %v2004_v51 = vpop.f32.mrb[24].mxu1  ;;  %v2255_v52 = vsel %vm580_vm2, %v2254_v50, -inf }
0x1053   : > { %2256 = vmax.xlane.f32.xlu0 %v2255_v52  ;;  %v3103_v53 = vpop.f32.mrb[25].mxu1 }
0x1054   : > { %v2847_v53 = vld [vmem:[%s4087_s10 + $0xa0] sm:$0xff] }
0x1056   : > { %v2082_v54 = vpop.f32.mrb[26].mxu1 }
0x1057   : > { %v2086_v55 = vmul.f32 0.35355338, %v2082_v54  ;;  %v3108_v56 = vpop.f32.mrb[27].mxu1  ;;  %v2848_v54 = vld [vmem:[%s4087_s10 + $0xa8] sm:$0xff] }
0x1059   : > { %v2087_v8 = vadd.f32 %v2086_v55, %v3650_v26  ;;  %v3248_v55 = vpack.c.bf16 %v2848_v54, %v2847_v53 }
0x105b   : > { %v2088_v57 = vsel %vm580_vm2, %v2087_v8, -inf }
0x105c   : > { %2089 = vmax.xlane.f32.xlu1 %v2088_v57 }
0x10e0   : > { %v2257_v58 = vpop.xlane.xlu0 %2256 }
0x10e1   : > { %v2258_v59 = vsub.f32 %v2254_v50, %v2257_v58  ;;  %v3242_v50 = vpack.c.bf16 %v2844_v48, %v2843_v47 }
0x10e3   : > { %v2259_v60 = vmul.f32 1.442695, %v2258_v59  ;;  %v2834_v59 = vld [vmem:[%s4083_s6 + $0x1] ss:$0 sm:$0xff] }
0x10e5   : > { %3352 = vpow2.f32 %v2259_v60 }
0x10e9   : > { %v2090_v61 = vpop.xlane.xlu1 %2089 }
0x10ea   : > { %v2091_v62 = vsub.f32 %v2087_v8, %v2090_v61  ;;  %v2835_v61 = vld [vmem:[%s4084_s7 + $0x1] ss:$0 sm:$0xff] }
0x10ec   : > { %v2092_v63 = vmul.f32 1.442695, %v2091_v62 }
0x10ee   : > { %3354 = vpow2.f32 %v2092_v63 }
0x10ef   : > { %v3353_v0 = vpop.eup %3352 }
0x10f0   : > { %v2261_v2 = vsel %vm580_vm2, %v3353_v0, 0.0 }
0x10f1   : > { %2262 = vadd.xlane.f32.xlu1 %v2261_v2  ;;  %v2850_v2 = vld [vmem:[%s4087_s10 + $0xb8] sm:$0xff] }
0x10f8   : > { %v3355_v4 = vpop.eup %3354 }
0x10f9   : > { %v2094_v7 = vsel %vm580_vm2, %v3355_v4, 0.0 }
0x10fa   : > { %2095 = vadd.xlane.f32.xlu0 %v2094_v7  ;;  %v2851_v7 = vld [vmem:[%s4087_s10 + $0xc0] sm:$0xff] }
0x1102   : > { %2266 = vrot.lane.b32.xlu1 %v3835_v5, %s4126_s28 }
0x1106   : > { %2343 = vrot.lane.b32.xlu1 %v2004_v51, %s4127_s20  ;;  %v2846_v51 = vld [vmem:[%s4087_s10 + $0x98] sm:$0xff]  ;;  %s2866_s20 = sshll.u32 %s3545_s17, 7  ;;  %s3448_s17 = smov [#allocation2]  }
0x1107   : > { %v3245_v52 = vpack.c.bf16 %v2846_v51, %v2845_v49  ;;  %s4034_s3 = scalar_lea.hbm %s4091_s14, %s2866_s20 }
0x1110   : > { %2099 = vrot.lane.b32.xlu0 %v3835_v5, %s4128_s21  ;;  %v2825_v5 = vld [vmem:[%s4081_s4 + $0x20] sm:$0xff]  ;;  %s4129_s21 = smov 16  }
0x1111   : > { %v3230_v17 = vpack.c.bf16 %v2826_v16, %v2825_v5  ;;  %v2857_v5 = vld [vmem:[%s4087_s10 + $0xf0] sm:$0xff]  ;;  %v2858_v16 = vld [vmem:[%s4087_s10 + $0xf8] sm:$0xff] }
0x1113   : > { %3231 = vmatpush3.bf16.msra.mxu0 %v3230_v17  ;;  %v3263_v17 = vpack.c.bf16 %v2858_v16, %v2857_v5 }
0x1114   : > { %3232 = vmatprep.subr.bf16.mxu0 %v3430_v3 }
0x1117   : > { %3234 = vmatpush3.bf16.msra.mxu0 %v3233_v20 }
0x1118   : > { %3241 = vmatprep.subr.bf16.mxu0 %v3430_v3 }
0x117e   : > { %v2263_v26 = vpop.xlane.xlu1 %2262 }
0x1182   : > { %v2267_v11 = vpop.permute.xlu1 %2266 }
0x1186   : > { %v2344_v25 = vpop.permute.xlu1 %2343 }
0x1187   : > { %v2096_v9 = vpop.xlane.xlu0 %2095  ;;  %v2354_v29 = vsel %vm580_vm2, %v3863_v27, %v2344_v25 }
0x1188   : > { %3356 = vrcp.f32 %v2096_v9 }
0x1189   : > { %3358 = vrcp.f32 %v2263_v26  ;;  %v2852_v26 = vld [vmem:[%s4087_s10 + $0xc8] sm:$0xff] }
0x118a   : > { %v3254_v9 = vpack.c.bf16 %v2852_v26, %v2851_v7 }
0x118b   : > { %v2100_v10 = vpop.permute.xlu0 %2099 }
0x118c   : > { %3110 = vmatpush3.msra.mxu1 %v2100_v10  ;;  %v2853_v10 = vld [vmem:[%s4087_s10 + $0xd0] sm:$0xff] }
0x118d   : > { %3119 = vmatprep.subr.mxu1 %v3432_v6 }
0x1192   : > { %v3357_v12 = vpop.eup %3356 }
0x1193   : > { %v2098_v13 = vmul.f32 %v3357_v12, %v3355_v4  ;;  %v3359_v14 = vpop.eup %3358  ;;  %v2854_v12 = vld [vmem:[%s4087_s10 + $0xd8] sm:$0xff] }
0x1194   : > { %v2265_v15 = vmul.f32 %v3359_v14, %v3353_v0  ;;  %v2849_v0 = vld [vmem:[%s4087_s10 + $0xb0] sm:$0xff]  ;;  %v2855_v14 = vld [vmem:[%s4087_s10 + $0xe0] sm:$0xff] }
0x1195   : > { %3112 = vmatmul.mubr.msk.f32.vlgmr.msra.gmra.mrb[28].mxu1 %vm580_vm2, %v2098_v13  ;;  %v3251_v4 = vpack.c.bf16 %v2850_v2, %v2849_v0  ;;  %v3257_v13 = vpack.c.bf16 %v2854_v12, %v2853_v10 }
0x1196   : > { %3120 = vmatpush3.msra.mxu1 %v2267_v11  ;;  %3121 = vmatprep.mubr.msk.f32.mxu1 %vm3431_vm0, %v3432_v6  ;;  %v2856_v11 = vld [vmem:[%s4087_s10 + $0xe8] sm:$0xff] }
0x1197   : > { %3235 = vmatprep.subr.bf16.mxu1 %v3430_v3 }
0x1199   : > { %3122 = vmatmul.mubr.msk.f32.vlgmr.msra.gmra.mrb[30].mxu1 %vm580_vm2, %v2265_v15  ;;  %v3260_v15 = vpack.c.bf16 %v2856_v11, %v2855_v14 }
0x119a   : > { %3143 = vmatprep.mubr.msk.f32.mxu1 %vm3431_vm0, %v3432_v6 }
0x1268   : > { %v2171_v21 = vpop.f32.mrb[28].mxu1 }
0x1269   : > { %2347 = vrot.lane.b32.xlu0 %v2171_v21, %s4129_s21  ;;  %v3113_v22 = vpop.f32.mrb[29].mxu1  ;;  %s469_s21 = scalar_lea.vmem [#allocation2], %s2780_s25  ;;  %s3370_s25 = sshll.u32 %s3448_s17, 4  ;;  %s3371_s25 = int_to_ptr.vmem [resolvable:$false] %s3370_s25 }
0x126a   : > { %s3372_s26 = scalar_lea.vmem %s3371_s25, 256 }
0x126c   : > { %v2338_v23 = vpop.f32.mrb[30].mxu1 }
0x126d   : > { %2351 = vrot.lane.b32.xlu1 %v2338_v23, %s4130_s27  ;;  %v3123_v24 = vpop.f32.mrb[31].mxu1  ;;  %s2708_s27 = sshll.u32 %s469_s21, 4  ;;  %s4036_s27 = int_to_ptr.vmem [resolvable:$true] %s2708_s27 }
0x126e   : > { %s3366_s22 = scalar_lea.vmem %s4036_s27, 128  ;;  %p3373_p0 = scmp.lt.s32.totalorder %s4036_s27, %s3371_s25 }
0x126f   : > { %p3367_p11 = scmp.ne.s32.totalorder %s4036_s27, %s3366_s22  ;;  %p3374_p1 = scmp.lt.s32.totalorder %s3372_s26, %s3366_s22 }
0x1271   : > { %p3368_p12 = pnand %p3367_p11, %p3562_p5  ;;  %p3375_p2 = por %p3374_p1, %p3373_p0 }
0x1273   : > { %p3369_p13 = pneg %p3368_p12 }
0x1275   : > { %p3376_p3 = pnand %p3375_p2, %p3369_p13 }
0x12db   : > { %v2348_v28 = vpop.permute.xlu0 %2347 }
0x12dc   : > { %v2355_v30 = vsel %vm1258_vm4, %v2354_v29, %v2348_v28  ;;  %v2860_v28 = vld [vmem:[%s4088_s11 + $0x1] ss:$0 sm:$0xff] }
0x12df   : > { %v2352_v31 = vpop.permute.xlu1 %2351 }
0x12e0   : > { %v2356_v32 = vsel %vm1260_vm5, %v2355_v30, %v2352_v31 }
0x12e1   : > { %3133 = vmatmul.mubr.msk.f32.vlgmr.msra.gmra.mrb[10].mxu0 %vm503_vm1, %v2356_v32 }
0x12e2   : > { %3178 = vmatprep.mubr.msk.f32.mxu0 %vm3431_vm0, %v3432_v6  ;;  %v2836_v6 = vld [vmem:[%s4085_s8 + $0x20] sm:$0xff]  ;;  %3243 = vmatpush3.bf16.msra.mxu0 %v3242_v50 }
0x12e3   : > { %v3236_v44 = vpack.c.bf16 %v2837_v43, %v2836_v6  ;;  %3244 = vmatprep.subr.bf16.mxu0 %v3430_v3  ;;  %v2864_v43 = vld [vmem:[%s4090_s13 + $0x1] ss:$0 sm:$0xff] }
0x12e5   : > { %3237 = vmatpush3.bf16.msra.mxu1 %v3236_v44 }
0x12e6   : > { %3238 = vmatprep.subr.bf16.mxu1 %v3430_v3  ;;  %3246 = vmatpush3.bf16.msra.mxu0 %v3245_v52 }
0x12e7   : > { %3247 = vmatprep.subr.bf16.mxu0 %v3430_v3 }
0x12ea   : > { %3249 = vmatpush3.bf16.msra.mxu0 %v3248_v55 }
0x12eb   : > { %3250 = vmatprep.subr.bf16.mxu0 %v3430_v3 }
0x12ee   : > { %3252 = vmatpush3.bf16.msra.mxu0 %v3251_v4 }
0x12ef   : > { %3253 = vmatprep.subr.bf16.mxu0 %v3430_v3 }
0x12f2   : > { %3255 = vmatpush3.bf16.msra.mxu0 %v3254_v9 }
0x12f3   : > { %3256 = vmatprep.subr.bf16.mxu0 %v3430_v3 }
0x12f6   : > { %3258 = vmatpush3.bf16.msra.mxu0 %v3257_v13 }
0x12f7   : > { %3259 = vmatprep.subr.bf16.mxu0 %v3430_v3 }
0x12fa   : > { %3261 = vmatpush3.bf16.msra.mxu0 %v3260_v15 }
0x12fb   : > { %3262 = vmatprep.subr.bf16.mxu0 %v3430_v3 }
0x12fe   : > { %3264 = vmatpush3.bf16.msra.mxu0 %v3263_v17 }
0x13b4   : > { %v2439_v34 = vpop.f32.mrb[10].mxu0 }
0x13b5   : > { %v2440_v35 = vadd.f32 %v2830_v33, %v2439_v34  ;;  %v3134_v36 = vpop.f32.mrb[11].mxu0 }
0x13b7   : > { %v2443_v37 = vadd.f32 %v2440_v35, %v3826_v1  ;;  %v2838_v1 = vld [vmem:[%s4085_s8 + $0x30] sm:$0xff] }
0x13b8   : > { %v3239_v46 = vpack.c.bf16 %v2839_v45, %v2838_v1 }
0x13b9   : > { %v2448_v27 = vsel %vm503_vm1, %v2443_v37, 0.0 }
0x13ba   : > { %2449 = vadd.xlane.f32.xlu0 %v2448_v27  ;;  %3240 = vmatpush3.bf16.msra.mxu1 %v3239_v46 }
0x1447   : > { %v2450_v38 = vpop.xlane.xlu0 %2449 }
0x1448   : > { %v2451_v39 = vmul.f32 0.03125, %v2450_v38 }
0x144a   : > { %v2452_v40 = vsub.f32 %v2443_v37, %v2451_v39 }
0x144c   : > { %v2453_v41 = vmul.f32 %v2452_v40, %v2452_v40 }
0x144e   : > { %v2454_v42 = vsel %vm503_vm1, %v2453_v41, 0.0 }
0x144f   : > { %2455 = vadd.xlane.f32.xlu1 %v2454_v42  ;;  %v2863_v42 = vld [vmem:[%s4089_s12 + $0x1] ss:$0 sm:$0xff] }
0x14dc   : > { %v2456_v56 = vpop.xlane.xlu1 %2455 }
0x14dd   : > { %v2457_v8 = vmul.f32 0.03125, %v2456_v56 }
0x14df   : > { %v2458_v57 = vadd.f32 1e-05, %v2457_v8 }
0x14e1   : > { %3360 = vrsqrt.f32 %v2458_v57 }
0x14eb   : > { %v3361_v58 = vpop.eup %3360 }
0x14ec   : > { %v2460_v60 = vmul.f32 %v3361_v58, %v2452_v40 }
0x14ee   : > { %v2467_v62 = vmul.f32 %v2834_v59, %v2460_v60 }
0x14f0   : > { %v2474_v63 = vadd.f32 %v2835_v61, %v2467_v62 }
0x14f2   : > { %3144 = vmatmul.mubr.msk.f32.vlgmr.msra.gmra.mrb[32].mxu1 %vm503_vm1, %v2474_v63 }
0x15c5   : > { %v2557_v19 = vpop.f32.mrb[32].mxu1 }
0x15c6   : > { %v2558_v20 = vadd.f32 %v2841_v18, %v2557_v19  ;;  %v3145_v21 = vpop.f32.mrb[33].mxu1 }
0x15c8   : > { %v2562_v22 = vmul.f32 0.70710677, %v2558_v20  ;;  %v2561_v23 = vmul.f32 0.5, %v2558_v20 }
0x15ca   : > { %3362 = verf.f32 %v2562_v22 }
0x15d4   : > { %v3363_v3 = vpop.eup %3362 }
0x15d5   : > { %v2564_v24 = vadd.f32 1.0, %v3363_v3 }
0x15d7   : > { %v2565_v25 = vmul.f32 %v2564_v24, %v2561_v23 }
0x15d9   : > { %3179 = vmatmul.mubr.f32.vlgmr.msra.gmra.mrb[12].mxu0 %v2565_v25 }
0x16ac   : > { %v2657_v29 = vpop.f32.mrb[12].mxu0 }
0x16ad   : > { %v2658_v30 = vadd.f32 %v2860_v28, %v2657_v29  ;;  %v3180_v31 = vpop.f32.mrb[13].mxu0 }
0x16af   : > { %v2661_v32 = vadd.f32 %v2658_v30, %v2474_v63 }
0x16b1   : > { %v2666_v33 = vsel %vm503_vm1, %v2661_v32, 0.0 }
0x16b2   : > { %2667 = vadd.xlane.f32.xlu0 %v2666_v33 }
0x173f   : > { %v2668_v34 = vpop.xlane.xlu0 %2667 }
0x1740   : > { %v2669_v35 = vmul.f32 0.03125, %v2668_v34 }
0x1742   : > { %v2670_v36 = vsub.f32 %v2661_v32, %v2669_v35 }
0x1744   : > { %v2671_v37 = vmul.f32 %v2670_v36, %v2670_v36 }
0x1746   : > { %v2672_v27 = vsel %vm503_vm1, %v2671_v37, 0.0 }
0x1747   : > { %2673 = vadd.xlane.f32.xlu0 %v2672_v27 }
0x17d4   : > { %v2674_v38 = vpop.xlane.xlu0 %2673 }
0x17d5   : > { %v2675_v39 = vmul.f32 0.03125, %v2674_v38 }
0x17d7   : > { %v2676_v40 = vadd.f32 1e-05, %v2675_v39 }
0x17d9   : > { %3364 = vrsqrt.f32 %v2676_v40 }
0x17e3   : > { %v3365_v41 = vpop.eup %3364 }
0x17e4   : > { %v2678_v6 = vmul.f32 %v3365_v41, %v2670_v36 }
0x17e6   : > { %v2685_v44 = vmul.f32 %v2863_v42, %v2678_v6 }
0x17e8   : > { %v2692_v1 = vadd.f32 %v2864_v43, %v2685_v44 }
0x17ea   : > { %2693 = vst.msk [vmem:[%s469_s21] sm:$0xff] %vm503_vm1, %v2692_v1 }
0x17eb   : > { %3379 = shalt.err (!%p3376_p3)
}
0x17ec   : > { %s3380_s2 = scalar_lea.hbm %s4034_s3, 128  ;;  %s3384_s20 = scalar_lea.hbm %s4091_s14, 256 }
0x17ed   : > { %p3381_p4 = scmp.ne.s32.totalorder %s4034_s3, %s3380_s2  ;;  %p3385_p9 = scmp.lt.u32.totalorder %s4034_s3, %s4091_s14 }
0x17ee   : > { %p3386_p10 = scmp.lt.u32.totalorder %s3384_s20, %s3380_s2  ;;  %p3388_p12 = scmp.lt.u32.totalorder %s3380_s2, %s4034_s3 }
0x17ef   : > { %p3382_p7 = pnand %p3381_p4, %p3562_p5 }
0x17f0   : > { %p3387_p11 = por %p3386_p10, %p3385_p9 }
0x17f1   : > { %p3383_p8 = pneg %p3382_p7 }
0x17f2   : > { %p3389_p13 = por %p3388_p12, %p3387_p11 }
0x17f4   : > { %p3390_p0 = pnand %p3389_p13, %p3383_p8 }
0x17f6   : > { %3393 = shalt.err (!%p3390_p0)
}
0x17f7   : > { %3265 = dma.vmem_to_hbm [thread:$0]  (%p3562_p5), %s4036_s27, 128, %s4034_s3, %s2695_s1  }
0x17f8 PF: > { %p3271_p1 = scmp.ge.s32.totalorder %s3428_s16, 2  ;;  %s2720_s22 = sand.u32 1, %s3416_s29  }
0x17f9   : > { %s2721_s17 = scalar_lea.sflag [#allocation3], %s2720_s22 }
0x17fa   : > { %p3268_p2 = pnand %p3271_p1, %p3566_p6 }
0x17fc   : > { %3411 = dma.done.wait (!%p3268_p2), %s2721_s17, 128  }
0x17fd   : > { %3413 = vsyncadd (!%p3268_p2), %s2721_s17, 4294967168  ;;  %s4131_s25 = sld [smem:[#allocation5_spill]]  ;;  %p24_p3 = scmp.ge.s32.totalorder %s3549_s19, 4  }
0x17fe   : > { %s4132_s29 = smov %s3420_s30  ;;  %s4133_s30 = smov %s3424_s15 }
0x17ff   : > { %s4135_s16 = smov %s3549_s19  ;;  %26 = sbr.rel (!%p24_p3) target bundleno = 8 (0x8), region = 126 }
0x1803   : > { %s4134_s15 = smov %s4131_s25 }
0x1806   :  { %2726 = vsyncpa [#allocation3], 1 }
0x1807   :  { %2728 = vsyncpa [#allocation3 + $0x1], 1 }

</bundles_post_ra>
